<compile_context>
chip_gen: v7x
topology: tpu7x:2x2x1
jax: 0.10.0
libtpu: 0.0.40
codegen_flags: <defaults>
</compile_context>

<pallas_src>
import numpy as np
import jax
import jax.numpy as jnp
from jax.experimental import pallas as pl
from jax.experimental.pallas import tpu as pltpu


def _round_up(v, m):
  return (v + m - 1) // m * m


# ------------------------------- fused kernel ------------------------------- #

def _make_fused_kernel(*, Wp, L1, L_out, S1, g_yL, c1, c_, add_residual):
  """Fused Bottleneck_Parallel kernel body (one image per grid step).

  Lane axis = flattened per-image 5x5-padded grid (Hp*Wp), plus zero guard lanes so every
  shifted tap window is an in-bounds lane-window load and every length is a multiple of 128.
    x_ref : (1, c1, Lx)      bf16 zero-extended padded input (also the residual source)
    w5_ref: (5, c_, 5*c1)    bf16 5x5-branch weights, row-major taps
    w3_ref: (3, c_, 3*c1)    bf16 3x3-branch weights, row-major taps
    w1_ref: (c_, c1)         bf16 1x1-branch weights
    b1_ref: (3, c_, 1)       f32 per-branch biases [1x1, 3x3, 5x5]
    w2_ref: (3, c2, 3*c_)    bf16 cv2 3x3 weights, row-major taps
    b2_ref: (c2, 1)          f32 cv2 bias
    m_ref : (1, L1)          f32 interior mask over the cv1 compute window
    o_ref : (1, c2, L_out)   f32 output on the padded grid (interior sliced in wrapper)
  """
  f32 = jnp.float32

  def kernel(x_ref, w5_ref, w3_ref, w1_ref, b1_ref, w2_ref, b2_ref, m_ref, o_ref):
    # hoisted loads (each operand is a single small VMEM tile)
    x = x_ref[0]            # (c1, Lx) bf16
    w5 = w5_ref[...]
    w3 = w3_ref[...]
    w1 = w1_ref[...]
    w2 = w2_ref[...]
    b1 = b1_ref[...]
    b2 = b2_ref[...]
    mask = m_ref[...]

    # ---- cv1: row-grouped K-stacked windows of x over the (L1-wide) compute window ----
    # stack for kernel row dy holds the 5 dx-shifted windows concatenated along channels.
    stacks = []
    for dy in range(5):
      base = S1 + (dy - 2) * Wp - 2
      stacks.append(jnp.concatenate(
          [x[:, base + dx: base + dx + L1] for dx in range(5)], axis=0))  # (5*c1, L1) bf16

    # 5x5 branch: 5 dots, K = 5*c1 (accumulator initialized from the first dot)
    z5 = jnp.dot(w5[0], stacks[0], preferred_element_type=f32)
    for dy in range(1, 5):
      z5 = z5 + jnp.dot(w5[dy], stacks[dy], preferred_element_type=f32)

    # 3x3 branch: 3 dots, K = 3*c1, reusing the inner dx blocks of the same stacks
    z3 = jnp.dot(w3[0], stacks[1][c1:4 * c1, :], preferred_element_type=f32)
    for ky in range(1, 3):
      z3 = z3 + jnp.dot(w3[ky], stacks[1 + ky][c1:4 * c1, :], preferred_element_type=f32)

    # 1x1 branch: 1 dot, K = c1 (center block of the center-row stack)
    z1 = jnp.dot(w1, stacks[2][2 * c1:3 * c1, :], preferred_element_type=f32)

    # per-branch bias + ReLU, then average; mask zeroes halo/guard lanes -> implicit
    # zero-padding of y for cv2 (all epilogue math stays f32)
    y = (jnp.maximum(z1 + b1[0], 0.0)
         + jnp.maximum(z3 + b1[1], 0.0)
         + jnp.maximum(z5 + b1[2], 0.0)) * (1.0 / 3.0)
    y = (y * mask).astype(jnp.bfloat16)              # (c_, L1) one cast, hoisted

    # ---- cv2: 3x3 Conv + BN + ReLU (+ residual): 3 row-grouped dots, K = 3*c_ ----
    acc = None
    for ky in range(3):
      base = g_yL + (ky - 1) * Wp - 1
      ys = jnp.concatenate(
          [y[:, base + kx: base + kx + L_out] for kx in range(3)], axis=0)  # (3*c_, L_out)
      d = jnp.dot(w2[ky], ys, preferred_element_type=f32)
      acc = d if acc is None else acc + d

    out = jnp.maximum(acc + b2, 0.0)
    if add_residual:
      out = out + x[:, S1 + g_yL: S1 + g_yL + L_out].astype(f32)   # c1 == c2
    o_ref[0] = out                                   # lane-dense (c2, L_out) full-width store

  return kernel


# ------------------------------ forward wrapper ------------------------------ #

def bottleneck_parallel_forward(x_nchw, params, shortcut=True):
  """Matches Bottleneck_Parallel.forward (PyTorch NCHW in/out)."""
  N, c1, H, W = x_nchw.shape
  c2 = params["cv2"]["w_oihw"].shape[0]
  c_ = params["cv1_1x1"]["w_oihw"].shape[0]
  add = bool(shortcut and (c1 == c2))

  Hp, Wp = H + 4, W + 4                  # 5x5 halo (covers the 1x1/3x3 branches too)
  Lg = Hp * Wp                           # per-image flattened padded grid
  pad5 = 2 * Wp + 2                      # max flattened tap offset of the 5x5 conv
  pad3 = Wp + 1                          # max flattened tap offset of the 3x3 conv

  # 128-aligned lane geometry (guard bands enlarged so all lengths are multiples of 128)
  L_out = _round_up(Lg, 128)             # output lanes per image
  g_yL = _round_up(pad3, 64)             # left margin of the output inside the y window
  L1 = _round_up(g_yL + L_out + pad3, 128)           # cv1 compute-window length
  g_xL = _round_up(g_yL + pad5, 128)                 # offset of grid index 0 inside x_ext
  S1 = g_xL - g_yL                                   # offset of the y window inside x_ext
  Lx = max(_round_up(S1 + pad5 + L1, 128), _round_up(g_xL + L_out, 128))

  # --- layout plumbing (tiny XLA ops): bf16 NCHW -> (N, c1, Lx) with halo + guard lanes ---
  x = x_nchw.astype(jnp.bfloat16)
  xpad = jnp.pad(x, ((0, 0), (0, 0), (2, 2), (2, 2)))          # (N, c1, Hp, Wp)
  x_flat = xpad.reshape(N, c1, Lg)
  x_ext = jnp.pad(x_flat, ((0, 0), (0, 0), (g_xL, Lx - g_xL - Lg)))   # (N, c1, Lx) bf16

  # interior mask over the cv1 compute window (1 inside the image's valid HxW region)
  m2d = np.zeros((Hp, Wp), np.float32)
  m2d[2:2 + H, 2:2 + W] = 1.0
  m_win = np.zeros((1, L1), np.float32)
  m_win[0, g_yL:g_yL + Lg] = m2d.reshape(-1)
  m_win = jnp.asarray(m_win)

  w5, w3, w1 = params["w5_rows"], params["w3_rows"], params["w1x1"]
  b1, w2, b2 = params["b1_stack"], params["w2_rows"], params["b2_col"]

  kernel = _make_fused_kernel(Wp=Wp, L1=L1, L_out=L_out, S1=S1, g_yL=g_yL,
                              c1=c1, c_=c_, add_residual=add)

  out_flat = pl.pallas_call(
      kernel,
      grid=(N,),
      in_specs=[
          pl.BlockSpec((1, c1, Lx), lambda n: (n, 0, 0)),          # per-image input block
          pl.BlockSpec((5, c_, 5 * c1), lambda n: (0, 0, 0)),      # weights: resident
          pl.BlockSpec((3, c_, 3 * c1), lambda n: (0, 0, 0)),
          pl.BlockSpec((c_, c1), lambda n: (0, 0)),
          pl.BlockSpec((3, c_, 1), lambda n: (0, 0, 0)),
          pl.BlockSpec((3, c2, 3 * c_), lambda n: (0, 0, 0)),
          pl.BlockSpec((c2, 1), lambda n: (0, 0)),
          pl.BlockSpec((1, L1), lambda n: (0, 0)),
      ],
      out_specs=pl.BlockSpec((1, c2, L_out), lambda n: (n, 0, 0)),
      out_shape=jax.ShapeDtypeStruct((N, c2, L_out), jnp.float32),
      compiler_params=pltpu.CompilerParams(
          dimension_semantics=("parallel",),        # batch images are independent
          vmem_limit_bytes=64 * 1024 * 1024),
  )(x_ext, w5, w3, w1, b1, w2, b2, m_win)

  out = out_flat[:, :, :Lg].reshape(N, c2, Hp, Wp)[:, :, 2:2 + H, 2:2 + W]
  return out


# ------------------------------ parameter setup ------------------------------ #

def make_conv_bn_params(key, cin, cout, k):
  """Conv2d + BatchNorm2d(eval) parameters, folded into effective weight/bias."""
  kw, kb, kg, kbeta, km, kv = jax.random.split(key, 6)
  fan_in = cin * k * k
  w = jax.random.normal(kw, (cout, cin, k, k), jnp.float32) / np.sqrt(fan_in)
  b = 0.1 * jax.random.normal(kb, (cout,), jnp.float32)
  gamma = 1.0 + 0.1 * jax.random.normal(kg, (cout,), jnp.float32)
  beta = 0.1 * jax.random.normal(kbeta, (cout,), jnp.float32)
  mean = 0.05 * jax.random.normal(km, (cout,), jnp.float32)
  var = 0.5 + 0.1 * jnp.abs(jax.random.normal(kv, (cout,), jnp.float32))
  eps = 1e-5
  scale = gamma / jnp.sqrt(var + eps)
  w_eff = w * scale[:, None, None, None]            # (O, I, k, k)
  b_eff = (b - mean) * scale + beta                 # (O,)
  return dict(k=k, w_oihw=w_eff, b=b_eff)


def _row_major_bf16(w_oihw):
  """(O, I, k, k) -> (k, O, k*I): row-major taps, dx-major columns, bf16 MXU operand."""
  w = np.asarray(w_oihw, np.float32)
  O, I, k, _ = w.shape
  out = np.transpose(w, (2, 0, 3, 1)).reshape(k, O, k * I)   # [ky][o][kx*I + i]
  return jnp.asarray(out, jnp.bfloat16)


def bottleneck_parallel_params(key, c1, c2, e=0.5):
  c_ = int(c2 * e)
  k1, k3, k5, kc2 = jax.random.split(key, 4)
  params = dict(
      cv1_1x1=make_conv_bn_params(k1, c1, c_, 1),
      cv1_3x3=make_conv_bn_params(k3, c1, c_, 3),
      cv1_5x5=make_conv_bn_params(k5, c1, c_, 5),
      cv2=make_conv_bn_params(kc2, c_, c2, 3),
  )
  # kernel-layout operands: bf16 tap-major weights, f32 column biases
  params["w5_rows"] = _row_major_bf16(params["cv1_5x5"]["w_oihw"])         # (5, c_, 5*c1)
  params["w3_rows"] = _row_major_bf16(params["cv1_3x3"]["w_oihw"])         # (3, c_, 3*c1)
  params["w1x1"] = jnp.asarray(np.asarray(params["cv1_1x1"]["w_oihw"])[:, :, 0, 0],
                               jnp.bfloat16)                               # (c_, c1)
  params["b1_stack"] = jnp.asarray(
      np.stack([np.asarray(params["cv1_1x1"]["b"], np.float32),
                np.asarray(params["cv1_3x3"]["b"], np.float32),
                np.asarray(params["cv1_5x5"]["b"], np.float32)])[:, :, None])  # (3, c_, 1)
  params["w2_rows"] = _row_major_bf16(params["cv2"]["w_oihw"])             # (3, c2, 3*c_)
  params["b2_col"] = jnp.asarray(np.asarray(params["cv2"]["b"], np.float32)[:, None])
  return params


# ----------------------------- pure-JAX reference ---------------------------- #

def _ref_conv_bn_relu(x_nhwc, p):
  k = p["k"]
  w_hwio = jnp.transpose(p["w_oihw"], (2, 3, 1, 0))
  y = jax.lax.conv_general_dilated(
      x_nhwc, w_hwio, (1, 1), [(k // 2, k // 2)] * 2,
      dimension_numbers=("NHWC", "HWIO", "NHWC"))
  return jnp.maximum(y + p["b"], 0.0)


def reference_forward(x_nchw, params, shortcut=True):
  c1 = x_nchw.shape[1]
  c2 = params["cv2"]["w_oihw"].shape[0]
  add = shortcut and (c1 == c2)
  x = jnp.transpose(x_nchw, (0, 2, 3, 1)).astype(jnp.float32)
  y = (_ref_conv_bn_relu(x, params["cv1_1x1"]) +
       _ref_conv_bn_relu(x, params["cv1_3x3"]) +
       _ref_conv_bn_relu(x, params["cv1_5x5"])) / 3.0
  out = _ref_conv_bn_relu(y, params["cv2"])
  if add:
    out = out + x
  return jnp.transpose(out, (0, 3, 1, 2))


# ----------------------------------- main ----------------------------------- #

if __name__ == "__main__":
  key = jax.random.PRNGKey(0)
  kx, kp = jax.random.split(key)

  N, C1, H, W = 2, 4, 16, 16
  C2 = 4                      # c1 == c2 and shortcut=True -> residual add path
  x = jax.random.normal(kx, (N, C1, H, W), jnp.float32)

  params = bottleneck_parallel_params(kp, C1, C2, e=0.5)

  out = jax.block_until_ready(bottleneck_parallel_forward(x, params, shortcut=True))
  ref = jax.block_until_ready(reference_forward(x, params, shortcut=True))

  # bf16 MXU operands vs. an f32 XLA reference -> loosened (but still tight) tolerance
  np.testing.assert_allclose(np.asarray(out), np.asarray(ref), rtol=3e-2, atol=3e-2)

  print("KERNEL_OK")
</pallas_src>

<mosaic_0001>
module attributes {stable_mosaic.version = 11 : i64} {
  func.func @kernel(%arg0: i32, %arg1: memref<1x4x768xbf16, #tpu.memory_space<vmem>>, %arg2: memref<5x2x20xbf16, #tpu.memory_space<vmem>>, %arg3: memref<3x2x12xbf16, #tpu.memory_space<vmem>>, %arg4: memref<2x4xbf16, #tpu.memory_space<vmem>>, %arg5: memref<3x2x1xf32, #tpu.memory_space<vmem>>, %arg6: memref<3x4x6xbf16, #tpu.memory_space<vmem>>, %arg7: memref<4x1xf32, #tpu.memory_space<vmem>>, %arg8: memref<1x640xf32, #tpu.memory_space<vmem>>, %arg9: memref<1x4x512xf32, #tpu.memory_space<vmem>>) attributes {dimension_semantics = [#tpu.dimension_semantics<parallel>], iteration_bounds = array<i64: 2>, scalar_prefetch = 0 : i64, scratch_operands = 0 : i64, tpu.core_type = #tpu.core_type<tc>, window_params = [{transform_indices = @transform_0, window_bounds = array<i64: 1, 4, 768>}, {pipeline_mode = #tpu.pipeline_mode<synchronous>, transform_indices = @transform_1, window_bounds = array<i64: 5, 2, 20>}, {pipeline_mode = #tpu.pipeline_mode<synchronous>, transform_indices = @transform_2, window_bounds = array<i64: 3, 2, 12>}, {pipeline_mode = #tpu.pipeline_mode<synchronous>, transform_indices = @transform_3, window_bounds = array<i64: 2, 4>}, {pipeline_mode = #tpu.pipeline_mode<synchronous>, transform_indices = @transform_4, window_bounds = array<i64: 3, 2, 1>}, {pipeline_mode = #tpu.pipeline_mode<synchronous>, transform_indices = @transform_5, window_bounds = array<i64: 3, 4, 6>}, {pipeline_mode = #tpu.pipeline_mode<synchronous>, transform_indices = @transform_6, window_bounds = array<i64: 4, 1>}, {pipeline_mode = #tpu.pipeline_mode<synchronous>, transform_indices = @transform_7, window_bounds = array<i64: 1, 640>}, {transform_indices = @transform_8, window_bounds = array<i64: 1, 4, 512>}]} {
    %c0 = arith.constant 0 : index
    %c0_0 = arith.constant 0 : index
    %c0_1 = arith.constant 0 : index
    %0 = vector.load %arg1[%c0, %c0_0, %c0_1] : memref<1x4x768xbf16, #tpu.memory_space<vmem>>, vector<1x4x768xbf16>
    %1 = vector.shape_cast %0 : vector<1x4x768xbf16> to vector<4x768xbf16>
    %c0_2 = arith.constant 0 : index
    %c0_3 = arith.constant 0 : index
    %c0_4 = arith.constant 0 : index
    %2 = vector.load %arg2[%c0_2, %c0_3, %c0_4] : memref<5x2x20xbf16, #tpu.memory_space<vmem>>, vector<5x2x20xbf16>
    %c0_5 = arith.constant 0 : index
    %c0_6 = arith.constant 0 : index
    %c0_7 = arith.constant 0 : index
    %3 = vector.load %arg3[%c0_5, %c0_6, %c0_7] : memref<3x2x12xbf16, #tpu.memory_space<vmem>>, vector<3x2x12xbf16>
    %c0_8 = arith.constant 0 : index
    %c0_9 = arith.constant 0 : index
    %4 = vector.load %arg4[%c0_8, %c0_9] : memref<2x4xbf16, #tpu.memory_space<vmem>>, vector<2x4xbf16>
    %c0_10 = arith.constant 0 : index
    %c0_11 = arith.constant 0 : index
    %c0_12 = arith.constant 0 : index
    %5 = vector.load %arg6[%c0_10, %c0_11, %c0_12] : memref<3x4x6xbf16, #tpu.memory_space<vmem>>, vector<3x4x6xbf16>
    %c0_13 = arith.constant 0 : index
    %c0_14 = arith.constant 0 : index
    %c0_15 = arith.constant 0 : index
    %6 = vector.load %arg5[%c0_13, %c0_14, %c0_15] : memref<3x2x1xf32, #tpu.memory_space<vmem>>, vector<3x2x1xf32>
    %c0_16 = arith.constant 0 : index
    %c0_17 = arith.constant 0 : index
    %7 = vector.load %arg7[%c0_16, %c0_17] : memref<4x1xf32, #tpu.memory_space<vmem>>, vector<4x1xf32>
    %c0_18 = arith.constant 0 : index
    %c0_19 = arith.constant 0 : index
    %8 = vector.load %arg8[%c0_18, %c0_19] : memref<1x640xf32, #tpu.memory_space<vmem>>, vector<1x640xf32>
    %9 = vector.extract_strided_slice %1 {offsets = [0, 22], sizes = [4, 640], strides = [1, 1]} : vector<4x768xbf16> to vector<4x640xbf16>
    %10 = vector.extract_strided_slice %1 {offsets = [0, 23], sizes = [4, 640], strides = [1, 1]} : vector<4x768xbf16> to vector<4x640xbf16>
    %11 = vector.extract_strided_slice %1 {offsets = [0, 24], sizes = [4, 640], strides = [1, 1]} : vector<4x768xbf16> to vector<4x640xbf16>
    %12 = vector.extract_strided_slice %1 {offsets = [0, 25], sizes = [4, 640], strides = [1, 1]} : vector<4x768xbf16> to vector<4x640xbf16>
    %13 = vector.extract_strided_slice %1 {offsets = [0, 26], sizes = [4, 640], strides = [1, 1]} : vector<4x768xbf16> to vector<4x640xbf16>
    %14 = tpu.concatenate %9, %10, %11, %12, %13 in 0 : vector<4x640xbf16>, vector<4x640xbf16>, vector<4x640xbf16>, vector<4x640xbf16>, vector<4x640xbf16> -> vector<20x640xbf16>
    %15 = vector.extract_strided_slice %1 {offsets = [0, 42], sizes = [4, 640], strides = [1, 1]} : vector<4x768xbf16> to vector<4x640xbf16>
    %16 = vector.extract_strided_slice %1 {offsets = [0, 43], sizes = [4, 640], strides = [1, 1]} : vector<4x768xbf16> to vector<4x640xbf16>
    %17 = vector.extract_strided_slice %1 {offsets = [0, 44], sizes = [4, 640], strides = [1, 1]} : vector<4x768xbf16> to vector<4x640xbf16>
    %18 = vector.extract_strided_slice %1 {offsets = [0, 45], sizes = [4, 640], strides = [1, 1]} : vector<4x768xbf16> to vector<4x640xbf16>
    %19 = vector.extract_strided_slice %1 {offsets = [0, 46], sizes = [4, 640], strides = [1, 1]} : vector<4x768xbf16> to vector<4x640xbf16>
    %20 = tpu.concatenate %15, %16, %17, %18, %19 in 0 : vector<4x640xbf16>, vector<4x640xbf16>, vector<4x640xbf16>, vector<4x640xbf16>, vector<4x640xbf16> -> vector<20x640xbf16>
    %21 = vector.extract_strided_slice %1 {offsets = [0, 62], sizes = [4, 640], strides = [1, 1]} : vector<4x768xbf16> to vector<4x640xbf16>
    %22 = vector.extract_strided_slice %1 {offsets = [0, 63], sizes = [4, 640], strides = [1, 1]} : vector<4x768xbf16> to vector<4x640xbf16>
    %23 = vector.extract_strided_slice %1 {offsets = [0, 64], sizes = [4, 640], strides = [1, 1]} : vector<4x768xbf16> to vector<4x640xbf16>
    %24 = vector.extract_strided_slice %1 {offsets = [0, 65], sizes = [4, 640], strides = [1, 1]} : vector<4x768xbf16> to vector<4x640xbf16>
    %25 = vector.extract_strided_slice %1 {offsets = [0, 66], sizes = [4, 640], strides = [1, 1]} : vector<4x768xbf16> to vector<4x640xbf16>
    %26 = tpu.concatenate %21, %22, %23, %24, %25 in 0 : vector<4x640xbf16>, vector<4x640xbf16>, vector<4x640xbf16>, vector<4x640xbf16>, vector<4x640xbf16> -> vector<20x640xbf16>
    %27 = vector.extract_strided_slice %1 {offsets = [0, 82], sizes = [4, 640], strides = [1, 1]} : vector<4x768xbf16> to vector<4x640xbf16>
    %28 = vector.extract_strided_slice %1 {offsets = [0, 83], sizes = [4, 640], strides = [1, 1]} : vector<4x768xbf16> to vector<4x640xbf16>
    %29 = vector.extract_strided_slice %1 {offsets = [0, 84], sizes = [4, 640], strides = [1, 1]} : vector<4x768xbf16> to vector<4x640xbf16>
    %30 = vector.extract_strided_slice %1 {offsets = [0, 85], sizes = [4, 640], strides = [1, 1]} : vector<4x768xbf16> to vector<4x640xbf16>
    %31 = vector.extract_strided_slice %1 {offsets = [0, 86], sizes = [4, 640], strides = [1, 1]} : vector<4x768xbf16> to vector<4x640xbf16>
    %32 = tpu.concatenate %27, %28, %29, %30, %31 in 0 : vector<4x640xbf16>, vector<4x640xbf16>, vector<4x640xbf16>, vector<4x640xbf16>, vector<4x640xbf16> -> vector<20x640xbf16>
    %33 = vector.extract_strided_slice %1 {offsets = [0, 102], sizes = [4, 640], strides = [1, 1]} : vector<4x768xbf16> to vector<4x640xbf16>
    %34 = vector.extract_strided_slice %1 {offsets = [0, 103], sizes = [4, 640], strides = [1, 1]} : vector<4x768xbf16> to vector<4x640xbf16>
    %35 = vector.extract_strided_slice %1 {offsets = [0, 104], sizes = [4, 640], strides = [1, 1]} : vector<4x768xbf16> to vector<4x640xbf16>
    %36 = vector.extract_strided_slice %1 {offsets = [0, 105], sizes = [4, 640], strides = [1, 1]} : vector<4x768xbf16> to vector<4x640xbf16>
    %37 = vector.extract_strided_slice %1 {offsets = [0, 106], sizes = [4, 640], strides = [1, 1]} : vector<4x768xbf16> to vector<4x640xbf16>
    %38 = tpu.concatenate %33, %34, %35, %36, %37 in 0 : vector<4x640xbf16>, vector<4x640xbf16>, vector<4x640xbf16>, vector<4x640xbf16>, vector<4x640xbf16> -> vector<20x640xbf16>
    %39 = vector.extract_strided_slice %2 {offsets = [0, 0, 0], sizes = [1, 2, 20], strides = [1, 1, 1]} : vector<5x2x20xbf16> to vector<1x2x20xbf16>
    %40 = vector.shape_cast %39 : vector<1x2x20xbf16> to vector<2x20xbf16>
    %cst = arith.constant dense<0.000000e+00> : vector<2x640xf32>
    %41 = tpu.matmul %40, %14, %cst {dimension_numbers = #tpu.dot_dimension_numbers<[1], [0], [0], [1], [0, 0, 1, 1], [], []>} : vector<2x20xbf16>, vector<20x640xbf16>, vector<2x640xf32> -> vector<2x640xf32>
    %42 = vector.extract_strided_slice %2 {offsets = [1, 0, 0], sizes = [1, 2, 20], strides = [1, 1, 1]} : vector<5x2x20xbf16> to vector<1x2x20xbf16>
    %43 = vector.shape_cast %42 : vector<1x2x20xbf16> to vector<2x20xbf16>
    %cst_20 = arith.constant dense<0.000000e+00> : vector<2x640xf32>
    %44 = tpu.matmul %43, %20, %cst_20 {dimension_numbers = #tpu.dot_dimension_numbers<[1], [0], [0], [1], [0, 0, 1, 1], [], []>} : vector<2x20xbf16>, vector<20x640xbf16>, vector<2x640xf32> -> vector<2x640xf32>
    %45 = arith.addf %41, %44 : vector<2x640xf32>
    %46 = vector.extract_strided_slice %2 {offsets = [2, 0, 0], sizes = [1, 2, 20], strides = [1, 1, 1]} : vector<5x2x20xbf16> to vector<1x2x20xbf16>
    %47 = vector.shape_cast %46 : vector<1x2x20xbf16> to vector<2x20xbf16>
    %cst_21 = arith.constant dense<0.000000e+00> : vector<2x640xf32>
    %48 = tpu.matmul %47, %26, %cst_21 {dimension_numbers = #tpu.dot_dimension_numbers<[1], [0], [0], [1], [0, 0, 1, 1], [], []>} : vector<2x20xbf16>, vector<20x640xbf16>, vector<2x640xf32> -> vector<2x640xf32>
    %49 = arith.addf %45, %48 : vector<2x640xf32>
    %50 = vector.extract_strided_slice %2 {offsets = [3, 0, 0], sizes = [1, 2, 20], strides = [1, 1, 1]} : vector<5x2x20xbf16> to vector<1x2x20xbf16>
    %51 = vector.shape_cast %50 : vector<1x2x20xbf16> to vector<2x20xbf16>
    %cst_22 = arith.constant dense<0.000000e+00> : vector<2x640xf32>
    %52 = tpu.matmul %51, %32, %cst_22 {dimension_numbers = #tpu.dot_dimension_numbers<[1], [0], [0], [1], [0, 0, 1, 1], [], []>} : vector<2x20xbf16>, vector<20x640xbf16>, vector<2x640xf32> -> vector<2x640xf32>
    %53 = arith.addf %49, %52 : vector<2x640xf32>
    %54 = vector.extract_strided_slice %2 {offsets = [4, 0, 0], sizes = [1, 2, 20], strides = [1, 1, 1]} : vector<5x2x20xbf16> to vector<1x2x20xbf16>
    %55 = vector.shape_cast %54 : vector<1x2x20xbf16> to vector<2x20xbf16>
    %cst_23 = arith.constant dense<0.000000e+00> : vector<2x640xf32>
    %56 = tpu.matmul %55, %38, %cst_23 {dimension_numbers = #tpu.dot_dimension_numbers<[1], [0], [0], [1], [0, 0, 1, 1], [], []>} : vector<2x20xbf16>, vector<20x640xbf16>, vector<2x640xf32> -> vector<2x640xf32>
    %57 = arith.addf %53, %56 : vector<2x640xf32>
    %58 = vector.extract_strided_slice %3 {offsets = [0, 0, 0], sizes = [1, 2, 12], strides = [1, 1, 1]} : vector<3x2x12xbf16> to vector<1x2x12xbf16>
    %59 = vector.shape_cast %58 : vector<1x2x12xbf16> to vector<2x12xbf16>
    %60 = vector.extract_strided_slice %20 {offsets = [4, 0], sizes = [12, 640], strides = [1, 1]} : vector<20x640xbf16> to vector<12x640xbf16>
    %cst_24 = arith.constant dense<0.000000e+00> : vector<2x640xf32>
    %61 = tpu.matmul %59, %60, %cst_24 {dimension_numbers = #tpu.dot_dimension_numbers<[1], [0], [0], [1], [0, 0, 1, 1], [], []>} : vector<2x12xbf16>, vector<12x640xbf16>, vector<2x640xf32> -> vector<2x640xf32>
    %62 = vector.extract_strided_slice %3 {offsets = [1, 0, 0], sizes = [1, 2, 12], strides = [1, 1, 1]} : vector<3x2x12xbf16> to vector<1x2x12xbf16>
    %63 = vector.shape_cast %62 : vector<1x2x12xbf16> to vector<2x12xbf16>
    %64 = vector.extract_strided_slice %26 {offsets = [4, 0], sizes = [12, 640], strides = [1, 1]} : vector<20x640xbf16> to vector<12x640xbf16>
    %cst_25 = arith.constant dense<0.000000e+00> : vector<2x640xf32>
    %65 = tpu.matmul %63, %64, %cst_25 {dimension_numbers = #tpu.dot_dimension_numbers<[1], [0], [0], [1], [0, 0, 1, 1], [], []>} : vector<2x12xbf16>, vector<12x640xbf16>, vector<2x640xf32> -> vector<2x640xf32>
    %66 = arith.addf %61, %65 : vector<2x640xf32>
    %67 = vector.extract_strided_slice %3 {offsets = [2, 0, 0], sizes = [1, 2, 12], strides = [1, 1, 1]} : vector<3x2x12xbf16> to vector<1x2x12xbf16>
    %68 = vector.shape_cast %67 : vector<1x2x12xbf16> to vector<2x12xbf16>
    %69 = vector.extract_strided_slice %32 {offsets = [4, 0], sizes = [12, 640], strides = [1, 1]} : vector<20x640xbf16> to vector<12x640xbf16>
    %cst_26 = arith.constant dense<0.000000e+00> : vector<2x640xf32>
    %70 = tpu.matmul %68, %69, %cst_26 {dimension_numbers = #tpu.dot_dimension_numbers<[1], [0], [0], [1], [0, 0, 1, 1], [], []>} : vector<2x12xbf16>, vector<12x640xbf16>, vector<2x640xf32> -> vector<2x640xf32>
    %71 = arith.addf %66, %70 : vector<2x640xf32>
    %72 = vector.extract_strided_slice %26 {offsets = [8, 0], sizes = [4, 640], strides = [1, 1]} : vector<20x640xbf16> to vector<4x640xbf16>
    %cst_27 = arith.constant dense<0.000000e+00> : vector<2x640xf32>
    %73 = tpu.matmul %4, %72, %cst_27 {dimension_numbers = #tpu.dot_dimension_numbers<[1], [0], [0], [1], [0, 0, 1, 1], [], []>} : vector<2x4xbf16>, vector<4x640xbf16>, vector<2x640xf32> -> vector<2x640xf32>
    %74 = vector.extract_strided_slice %6 {offsets = [0, 0, 0], sizes = [1, 2, 1], strides = [1, 1, 1]} : vector<3x2x1xf32> to vector<1x2x1xf32>
    %75 = vector.shape_cast %74 : vector<1x2x1xf32> to vector<2x1xf32>
    %76 = vector.broadcast %75 : vector<2x1xf32> to vector<2x640xf32>
    %77 = arith.addf %73, %76 : vector<2x640xf32>
    %cst_28 = arith.constant 0.000000e+00 : f32
    %78 = vector.broadcast %cst_28 : f32 to vector<2x640xf32>
    %79 = arith.maximumf %77, %78 : vector<2x640xf32>
    %80 = vector.extract_strided_slice %6 {offsets = [1, 0, 0], sizes = [1, 2, 1], strides = [1, 1, 1]} : vector<3x2x1xf32> to vector<1x2x1xf32>
    %81 = vector.shape_cast %80 : vector<1x2x1xf32> to vector<2x1xf32>
    %82 = vector.broadcast %81 : vector<2x1xf32> to vector<2x640xf32>
    %83 = arith.addf %71, %82 : vector<2x640xf32>
    %cst_29 = arith.constant 0.000000e+00 : f32
    %84 = vector.broadcast %cst_29 : f32 to vector<2x640xf32>
    %85 = arith.maximumf %83, %84 : vector<2x640xf32>
    %86 = arith.addf %79, %85 : vector<2x640xf32>
    %87 = vector.extract_strided_slice %6 {offsets = [2, 0, 0], sizes = [1, 2, 1], strides = [1, 1, 1]} : vector<3x2x1xf32> to vector<1x2x1xf32>
    %88 = vector.shape_cast %87 : vector<1x2x1xf32> to vector<2x1xf32>
    %89 = vector.broadcast %88 : vector<2x1xf32> to vector<2x640xf32>
    %90 = arith.addf %57, %89 : vector<2x640xf32>
    %cst_30 = arith.constant 0.000000e+00 : f32
    %91 = vector.broadcast %cst_30 : f32 to vector<2x640xf32>
    %92 = arith.maximumf %90, %91 : vector<2x640xf32>
    %93 = arith.addf %86, %92 : vector<2x640xf32>
    %cst_31 = arith.constant 0.333333343 : f32
    %94 = vector.broadcast %cst_31 : f32 to vector<2x640xf32>
    %95 = arith.mulf %93, %94 : vector<2x640xf32>
    %96 = vector.broadcast %8 : vector<1x640xf32> to vector<2x640xf32>
    %97 = arith.mulf %95, %96 : vector<2x640xf32>
    %98 = arith.truncf %97 : vector<2x640xf32> to vector<2x640xbf16>
    %99 = vector.extract_strided_slice %98 {offsets = [0, 43], sizes = [2, 512], strides = [1, 1]} : vector<2x640xbf16> to vector<2x512xbf16>
    %100 = vector.extract_strided_slice %98 {offsets = [0, 44], sizes = [2, 512], strides = [1, 1]} : vector<2x640xbf16> to vector<2x512xbf16>
    %101 = vector.extract_strided_slice %98 {offsets = [0, 45], sizes = [2, 512], strides = [1, 1]} : vector<2x640xbf16> to vector<2x512xbf16>
    %102 = tpu.concatenate %99, %100, %101 in 0 : vector<2x512xbf16>, vector<2x512xbf16>, vector<2x512xbf16> -> vector<6x512xbf16>
    %103 = vector.extract_strided_slice %5 {offsets = [0, 0, 0], sizes = [1, 4, 6], strides = [1, 1, 1]} : vector<3x4x6xbf16> to vector<1x4x6xbf16>
    %104 = vector.shape_cast %103 : vector<1x4x6xbf16> to vector<4x6xbf16>
    %cst_32 = arith.constant dense<0.000000e+00> : vector<4x512xf32>
    %105 = tpu.matmul %104, %102, %cst_32 {dimension_numbers = #tpu.dot_dimension_numbers<[1], [0], [0], [1], [0, 0, 1, 1], [], []>} : vector<4x6xbf16>, vector<6x512xbf16>, vector<4x512xf32> -> vector<4x512xf32>
    %106 = vector.extract_strided_slice %98 {offsets = [0, 63], sizes = [2, 512], strides = [1, 1]} : vector<2x640xbf16> to vector<2x512xbf16>
    %107 = vector.extract_strided_slice %98 {offsets = [0, 64], sizes = [2, 512], strides = [1, 1]} : vector<2x640xbf16> to vector<2x512xbf16>
    %108 = vector.extract_strided_slice %98 {offsets = [0, 65], sizes = [2, 512], strides = [1, 1]} : vector<2x640xbf16> to vector<2x512xbf16>
    %109 = tpu.concatenate %106, %107, %108 in 0 : vector<2x512xbf16>, vector<2x512xbf16>, vector<2x512xbf16> -> vector<6x512xbf16>
    %110 = vector.extract_strided_slice %5 {offsets = [1, 0, 0], sizes = [1, 4, 6], strides = [1, 1, 1]} : vector<3x4x6xbf16> to vector<1x4x6xbf16>
    %111 = vector.shape_cast %110 : vector<1x4x6xbf16> to vector<4x6xbf16>
    %cst_33 = arith.constant dense<0.000000e+00> : vector<4x512xf32>
    %112 = tpu.matmul %111, %109, %cst_33 {dimension_numbers = #tpu.dot_dimension_numbers<[1], [0], [0], [1], [0, 0, 1, 1], [], []>} : vector<4x6xbf16>, vector<6x512xbf16>, vector<4x512xf32> -> vector<4x512xf32>
    %113 = arith.addf %105, %112 : vector<4x512xf32>
    %114 = vector.extract_strided_slice %98 {offsets = [0, 83], sizes = [2, 512], strides = [1, 1]} : vector<2x640xbf16> to vector<2x512xbf16>
    %115 = vector.extract_strided_slice %98 {offsets = [0, 84], sizes = [2, 512], strides = [1, 1]} : vector<2x640xbf16> to vector<2x512xbf16>
    %116 = vector.extract_strided_slice %98 {offsets = [0, 85], sizes = [2, 512], strides = [1, 1]} : vector<2x640xbf16> to vector<2x512xbf16>
    %117 = tpu.concatenate %114, %115, %116 in 0 : vector<2x512xbf16>, vector<2x512xbf16>, vector<2x512xbf16> -> vector<6x512xbf16>
    %118 = vector.extract_strided_slice %5 {offsets = [2, 0, 0], sizes = [1, 4, 6], strides = [1, 1, 1]} : vector<3x4x6xbf16> to vector<1x4x6xbf16>
    %119 = vector.shape_cast %118 : vector<1x4x6xbf16> to vector<4x6xbf16>
    %cst_34 = arith.constant dense<0.000000e+00> : vector<4x512xf32>
    %120 = tpu.matmul %119, %117, %cst_34 {dimension_numbers = #tpu.dot_dimension_numbers<[1], [0], [0], [1], [0, 0, 1, 1], [], []>} : vector<4x6xbf16>, vector<6x512xbf16>, vector<4x512xf32> -> vector<4x512xf32>
    %121 = arith.addf %113, %120 : vector<4x512xf32>
    %122 = vector.broadcast %7 : vector<4x1xf32> to vector<4x512xf32>
    %123 = arith.addf %121, %122 : vector<4x512xf32>
    %cst_35 = arith.constant 0.000000e+00 : f32
    %124 = vector.broadcast %cst_35 : f32 to vector<4x512xf32>
    %125 = arith.maximumf %123, %124 : vector<4x512xf32>
    %126 = vector.extract_strided_slice %1 {offsets = [0, 128], sizes = [4, 512], strides = [1, 1]} : vector<4x768xbf16> to vector<4x512xbf16>
    %127 = arith.extf %126 : vector<4x512xbf16> to vector<4x512xf32>
    %128 = arith.addf %125, %127 : vector<4x512xf32>
    %c0_36 = arith.constant 0 : index
    %c0_37 = arith.constant 0 : index
    %c0_38 = arith.constant 0 : index
    %129 = vector.load %arg9[%c0_36, %c0_37, %c0_38] : memref<1x4x512xf32, #tpu.memory_space<vmem>>, vector<1x4x512xf32>
    %130 = vector.shape_cast %129 : vector<1x4x512xf32> to vector<4x512xf32>
    %131 = vector.shape_cast %128 : vector<4x512xf32> to vector<1x4x512xf32>
    tpu.vector_store %arg9[%c0_36, %c0_37, %c0_38], %131 {strides = array<i32>} : memref<1x4x512xf32, #tpu.memory_space<vmem>>, vector<1x4x512xf32>,
    return
  }
  func.func @transform_0(%arg0: i32) -> (i32, i32, i32) {
    %c0_i32 = arith.constant 0 : i32
    %c0_i32_0 = arith.constant 0 : i32
    %c0_i32_1 = arith.constant 0 : i32
    return %arg0, %c0_i32, %c0_i32_0 : i32, i32, i32
  }
  func.func @transform_1(%arg0: i32) -> (i32, i32, i32) {
    %c0_i32 = arith.constant 0 : i32
    %c0_i32_0 = arith.constant 0 : i32
    %c0_i32_1 = arith.constant 0 : i32
    %c0_i32_2 = arith.constant 0 : i32
    return %c0_i32, %c0_i32_0, %c0_i32_1 : i32, i32, i32
  }
  func.func @transform_2(%arg0: i32) -> (i32, i32, i32) {
    %c0_i32 = arith.constant 0 : i32
    %c0_i32_0 = arith.constant 0 : i32
    %c0_i32_1 = arith.constant 0 : i32
    %c0_i32_2 = arith.constant 0 : i32
    return %c0_i32, %c0_i32_0, %c0_i32_1 : i32, i32, i32
  }
  func.func @transform_3(%arg0: i32) -> (i32, i32) {
    %c0_i32 = arith.constant 0 : i32
    %c0_i32_0 = arith.constant 0 : i32
    %c0_i32_1 = arith.constant 0 : i32
    return %c0_i32, %c0_i32_0 : i32, i32
  }
  func.func @transform_4(%arg0: i32) -> (i32, i32, i32) {
    %c0_i32 = arith.constant 0 : i32
    %c0_i32_0 = arith.constant 0 : i32
    %c0_i32_1 = arith.constant 0 : i32
    %c0_i32_2 = arith.constant 0 : i32
    return %c0_i32, %c0_i32_0, %c0_i32_1 : i32, i32, i32
  }
  func.func @transform_5(%arg0: i32) -> (i32, i32, i32) {
    %c0_i32 = arith.constant 0 : i32
    %c0_i32_0 = arith.constant 0 : i32
    %c0_i32_1 = arith.constant 0 : i32
    %c0_i32_2 = arith.constant 0 : i32
    return %c0_i32, %c0_i32_0, %c0_i32_1 : i32, i32, i32
  }
  func.func @transform_6(%arg0: i32) -> (i32, i32) {
    %c0_i32 = arith.constant 0 : i32
    %c0_i32_0 = arith.constant 0 : i32
    %c0_i32_1 = arith.constant 0 : i32
    return %c0_i32, %c0_i32_0 : i32, i32
  }
  func.func @transform_7(%arg0: i32) -> (i32, i32) {
    %c0_i32 = arith.constant 0 : i32
    %c0_i32_0 = arith.constant 0 : i32
    %c0_i32_1 = arith.constant 0 : i32
    return %c0_i32, %c0_i32_0 : i32, i32
  }
  func.func @transform_8(%arg0: i32) -> (i32, i32, i32) {
    %c0_i32 = arith.constant 0 : i32
    %c0_i32_0 = arith.constant 0 : i32
    %c0_i32_1 = arith.constant 0 : i32
    return %arg0, %c0_i32, %c0_i32_0 : i32, i32, i32
  }
}

</mosaic_0001>

<bundles_post_ra>
// kernel: tpu_custom_call.1
= control target key start
LH: loop header
LB: loop body
LE: loop exit
PB: predicated region body
PF: predicated region fallthrough
CT: control target
= control target key end

     0   :  { %s4641_s0 = inlined_call_operand.hbm [shape: bf16[2,4,768], index: 0, kind: input, shape index: {}]   ;;  %s4642_s1 = inlined_call_operand.hbm [shape: bf16[5,2,20], index: 1, kind: input, shape index: {}]   ;;  %s4643_s2 = inlined_call_operand.hbm [shape: bf16[3,2,12], index: 2, kind: input, shape index: {}]   ;;  %s4644_s3 = inlined_call_operand.hbm [shape: bf16[2,4], index: 3, kind: input, shape index: {}]   ;;  %s4645_s4 = inlined_call_operand.hbm [shape: f32[3,2,1], index: 4, kind: input, shape index: {}]   ;;  %s4646_s5 = inlined_call_operand.hbm [shape: bf16[3,4,6], index: 5, kind: input, shape index: {}]   ;;  %s4647_s6 = inlined_call_operand.hbm [shape: f32[4,1], index: 6, kind: input, shape index: {}]   ;;  %s4648_s7 = inlined_call_operand.hbm [shape: f32[1,640], index: 7, kind: input, shape index: {}]   ;;  %s4649_s8 = inlined_call_operand.hbm [shape: f32[2,4,512], index: 8, kind: output, shape index: {}]  }
   0x1   :  { %4655 = sst [smem:[#allocation23_spill]] %s4642_s1 }
   0x2   :  { %4656 = sst [smem:[#allocation24_spill]] %s4644_s3 }
   0x3   :  { %13 = vsyncpa [#allocation3], 0 }
   0x4   :  { %15 = vsyncpa [#allocation3 + $0x1], 0 }
   0x5   :  { %16 = vsyncpa [#allocation6], 0 }
   0x6   :  { %17 = vsyncpa [#allocation9], 0 }
   0x7   :  { %18 = vsyncpa [#allocation12], 0 }
   0x8   :  { %19 = vsyncpa [#allocation15], 0 }
   0x9   :  { %20 = vsyncpa [#allocation4], 0 }
   0xa   :  { %22 = vsyncpa [#allocation4 + $0x1], 0  ;;  %s3574_s27 = smov 0   ;;  %s3576_s28 = smov 0  }
   0xb   :  { %s3578_s29 = smov 0   ;;  %s3580_s30 = smov 0  }
   0xc LB: > { %s3500_s9 = smov [#allocation5]   ;;  %s3595_s11 = sadd.s32 4294967295, %s3498_s30   ;;  %s3498_s30 = sphi %s3580_s30, %s4684_s30   ;;  %s3494_s29 = sphi %s3578_s29, %s4683_s29   ;;  %s3490_s28 = sphi %s3576_s28, %s4682_s28   ;;  %s3486_s27 = sphi %s3574_s27, %s4681_s27  }
   0xd   : > { %s244_s10 = sshll.u32 %s3500_s9, 4  ;;  %p2874_p0 = scmp.ge.s32.totalorder %s3498_s30, 1  ;;  %s3600_s10 = int_to_ptr.vmem [resolvable:$true] %s244_s10 }
   0xe   : > { %p4650_p1 = scmp.eq.s32.totalorder %s3595_s11, 0  ;;  %p232_p2 = scmp.lt.s32.totalorder %s3498_s30, 3 }
   0xf   : > { %s3501_s13 = smov [#allocation8]   ;;  %s3502_s16 = smov [#allocation11]  }
  0x10   : > { %p3602_p3 = pnand %p2874_p0, %p232_p2  ;;  %s271_s14 = sshll.u32 %s3501_s13, 4  ;;  %s3615_s14 = int_to_ptr.vmem [resolvable:$true] %s271_s14 }
  0x11   : > { %s3617_s17 = sshll.u32 %s3502_s16, 4  ;;  %s4659_s1 = sld [smem:[#allocation23_spill]]  ;;  %s295_s17 = int_to_ptr.vmem [resolvable:$true] %s3617_s17 }
  0x12   : > { %s4657_s12 = scalar_select %p3602_p3, 1, 0 }
  0x13   : > { %p3078_p5 = pneg %p3602_p3 }
  0x15   : > { %p3611_p6 = pnand %p3078_p5, %p4650_p1 }
  0x17   : > { %s3190_s20 = scalar_lea.hbm %s4659_s1, 80  ;;  %p3627_p8 = pneg %p3611_p6 }
  0x18   : > { %p3191_p7 = scmp.ne.s32.totalorder %s4659_s1, %s3190_s20  ;;  %p3197_p11 = scmp.lt.u32.totalorder %s3190_s20, %s4659_s1 }
  0x1a   : > { %p3193_p9 = pnand %p3627_p8, %p3191_p7 }
  0x1c   : > { %p3194_p10 = pneg %p3193_p9 }
  0x1e   : > { %p3199_p12 = pnand %p3197_p11, %p3194_p10 }
  0x20   : > { %3202 = shalt.err (!%p3199_p12)
}
  0x21   : > { %s3203_s26 = scalar_lea.vmem %s3600_s10, 80  ;;  %s3210_s9 = scalar_lea.vmem %s3600_s10, 96 }
  0x22   : > { %p3204_p13 = scmp.ne.s32.totalorder %s3600_s10, %s3203_s26  ;;  %p3211_p5 = scmp.lt.s32.totalorder %s3600_s10, %s3600_s10 }
  0x23   : > { %p3212_p7 = scmp.lt.s32.totalorder %s3210_s9, %s3203_s26 }
  0x24   : > { %p3206_p0 = pnand %p3204_p13, %p3627_p8 }
  0x25   : > { %p3213_p9 = por %p3212_p7, %p3211_p5 }
  0x26   : > { %p3207_p2 = pneg %p3206_p0 }
  0x28   : > { %p3214_p4 = pnand %p3213_p9, %p3207_p2 }
  0x2a   : > { %3217 = shalt.err (!%p3214_p4)
}
  0x2b   : > { %s4652_s13 = smov 16   ;;  %s4653_s16 = smov 1  }
  0x2c   : > { %3081 = dma.hbm_to_vmem [thread:$0]  (!%p3611_p6), %s4659_s1, 80, %s3600_s10, [#allocation6], %s4652_s13, %s4652_s13, %s4653_s16  }
  0x2d   : > { %s4661_s3 = sld [smem:[#allocation24_spill]] }
  0x33   : > { %s3218_s22 = scalar_lea.hbm %s4661_s3, 16 }
  0x34   : > { %p3219_p4 = scmp.ne.s32.totalorder %s4661_s3, %s3218_s22  ;;  %p3225_p12 = scmp.lt.u32.totalorder %s3218_s22, %s4661_s3 }
  0x36   : > { %p3221_p10 = pnand %p3219_p4, %p3627_p8 }
  0x38   : > { %p3222_p11 = pneg %p3221_p10 }
  0x3a   : > { %p3227_p13 = pnand %p3225_p12, %p3222_p11 }
  0x3c   : > { %3230 = shalt.err (!%p3227_p13)
}
  0x3d   : > { %s3231_s10 = scalar_lea.vmem %s3615_s14, 16  ;;  %s3238_s18 = scalar_lea.vmem %s3615_s14, 32 }
  0x3e   : > { %p3232_p0 = scmp.ne.s32.totalorder %s3615_s14, %s3231_s10  ;;  %p3239_p7 = scmp.lt.s32.totalorder %s3615_s14, %s3615_s14 }
  0x3f   : > { %p3240_p9 = scmp.lt.s32.totalorder %s3238_s18, %s3231_s10 }
  0x40   : > { %p3234_p2 = pnand %p3232_p0, %p3627_p8 }
  0x41   : > { %p3241_p4 = por %p3240_p9, %p3239_p7 }
  0x42   : > { %p3235_p5 = pneg %p3234_p2 }
  0x44   : > { %p3242_p10 = pnand %p3241_p4, %p3235_p5 }
  0x46   : > { %3245 = shalt.err (!%p3242_p10)
}
  0x47   : > { %3087 = dma.hbm_to_vmem [thread:$0]  (!%p3611_p6), %s4661_s3, 16, %s3615_s14, [#allocation9]  }
  0x48   : > { %s3246_s24 = scalar_lea.hbm %s4646_s5, 96 }
  0x49   : > { %p3247_p11 = scmp.ne.s32.totalorder %s4646_s5, %s3246_s24  ;;  %p3253_p0 = scmp.lt.u32.totalorder %s3246_s24, %s4646_s5 }
  0x4b   : > { %p3249_p12 = pnand %p3247_p11, %p3627_p8 }
  0x4d   : > { %p3250_p13 = pneg %p3249_p12 }
  0x4f   : > { %p3255_p2 = pnand %p3253_p0, %p3250_p13 }
  0x51   : > { %3258 = shalt.err (!%p3255_p2)
}
  0x52   : > { %s3259_s18 = scalar_lea.vmem %s295_s17, 96  ;;  %p3267_p4 = scmp.lt.s32.totalorder %s295_s17, %s295_s17 }
  0x53   : > { %p3260_p5 = scmp.ne.s32.totalorder %s295_s17, %s3259_s18  ;;  %p3268_p10 = scmp.lt.s32.totalorder %s3259_s18, %s3259_s18 }
  0x55   : > { %p3262_p7 = pnand %p3260_p5, %p3627_p8  ;;  %p3269_p1 = por %p3268_p10, %p3267_p4 }
  0x57   : > { %p3263_p9 = pneg %p3262_p7 }
  0x59   : > { %p3270_p3 = pnand %p3269_p1, %p3263_p9 }
  0x5b   : > { %3273 = shalt.err (!%p3270_p3)
}
  0x5c   : > { %s3505_s14 = smov 32   ;;  %s3506_s19 = smov 2  }
  0x5d   : > { %3093 = dma.hbm_to_vmem [thread:$0]  (!%p3611_p6), %s4646_s5, 96, %s295_s17, [#allocation12], %s3505_s14, %s3505_s14, %s3506_s19  }
  0x5e   : > { %s3507_s22 = smov [#allocation7]   ;;  %s3508_s25 = smov [#allocation10]  }
  0x5f   : > { %s257_s24 = sshll.u32 %s3507_s22, 4  ;;  %s281_s26 = sshll.u32 %s3508_s25, 4  ;;  %s258_s24 = int_to_ptr.vmem [resolvable:$true] %s257_s24  ;;  %s282_s26 = int_to_ptr.vmem [resolvable:$true] %s281_s26 }
  0x60   : > { %s3274_s18 = scalar_lea.hbm %s4643_s2, 48 }
  0x61   : > { %p3275_p1 = scmp.ne.s32.totalorder %s4643_s2, %s3274_s18  ;;  %p3281_p12 = scmp.lt.u32.totalorder %s3274_s18, %s4643_s2 }
  0x63   : > { %p3277_p3 = pnand %p3275_p1, %p3627_p8 }
  0x65   : > { %p3278_p11 = pneg %p3277_p3 }
  0x67   : > { %p3283_p13 = pnand %p3281_p12, %p3278_p11 }
  0x69   : > { %3286 = shalt.err (!%p3283_p13)
}
  0x6a   : > { %s3287_s17 = scalar_lea.vmem %s258_s24, 48  ;;  %s3294_s20 = scalar_lea.vmem %s258_s24, 64 }
  0x6b   : > { %p3288_p0 = scmp.ne.s32.totalorder %s258_s24, %s3287_s17  ;;  %p3295_p7 = scmp.lt.s32.totalorder %s258_s24, %s258_s24 }
  0x6c   : > { %p3296_p9 = scmp.lt.s32.totalorder %s3294_s20, %s3287_s17 }
  0x6d   : > { %p3290_p2 = pnand %p3288_p0, %p3627_p8 }
  0x6e   : > { %p3297_p4 = por %p3296_p9, %p3295_p7 }
  0x6f   : > { %p3291_p5 = pneg %p3290_p2 }
  0x71   : > { %p3298_p10 = pnand %p3297_p4, %p3291_p5 }
  0x73   : > { %3301 = shalt.err (!%p3298_p10)
}
  0x74   : > { %s4662_s13 = smov 1   ;;  %s4663_s16 = smov 16  }
  0x75   : > { %3084 = dma.hbm_to_vmem [thread:$0]  (!%p3611_p6), %s4643_s2, 48, %s258_s24, [#allocation6], %s4663_s16, %s4663_s16, %s4662_s13  }
  0x76   : > { %s3302_s25 = scalar_lea.hbm %s4645_s4, 96 }
  0x77   : > { %p3303_p1 = scmp.ne.s32.totalorder %s4645_s4, %s3302_s25  ;;  %p3309_p12 = scmp.lt.u32.totalorder %s3302_s25, %s4645_s4 }
  0x79   : > { %p3305_p3 = pnand %p3303_p1, %p3627_p8 }
  0x7b   : > { %p3306_p11 = pneg %p3305_p3 }
  0x7d   : > { %p3311_p13 = pnand %p3309_p12, %p3306_p11 }
  0x7f   : > { %3314 = shalt.err (!%p3311_p13)
}
  0x80   : > { %s3315_s20 = scalar_lea.vmem %s282_s26, 96  ;;  %p3323_p7 = scmp.lt.s32.totalorder %s282_s26, %s282_s26 }
  0x81   : > { %p3316_p0 = scmp.ne.s32.totalorder %s282_s26, %s3315_s20  ;;  %p3324_p9 = scmp.lt.s32.totalorder %s3315_s20, %s3315_s20 }
  0x83   : > { %p3318_p2 = pnand %p3316_p0, %p3627_p8  ;;  %p3325_p4 = por %p3324_p9, %p3323_p7 }
  0x85   : > { %p3319_p5 = pneg %p3318_p2 }
  0x87   : > { %p3326_p10 = pnand %p3325_p4, %p3319_p5 }
  0x89   : > { %3329 = shalt.err (!%p3326_p10)
}
  0x8a   : > { %3090 = dma.hbm_to_vmem [thread:$0]  (!%p3611_p6), %s4645_s4, 96, %s282_s26, [#allocation9], %s3505_s14, %s3505_s14, %s3506_s19  }
  0x8b   : > { %s3509_s16 = smov [#allocation13]   ;;  %s3510_s3 = smov [#allocation14]  }
  0x8c   : > { %s308_s1 = sshll.u32 %s3509_s16, 4  ;;  %s319_s21 = sshll.u32 %s3510_s3, 4  ;;  %s309_s1 = int_to_ptr.vmem [resolvable:$true] %s308_s1  ;;  %s320_s21 = int_to_ptr.vmem [resolvable:$true] %s319_s21 }
  0x8d   : > { %s3330_s9 = scalar_lea.hbm %s4647_s6, 64 }
  0x8e   : > { %p3331_p1 = scmp.ne.s32.totalorder %s4647_s6, %s3330_s9  ;;  %p3337_p12 = scmp.lt.u32.totalorder %s3330_s9, %s4647_s6 }
  0x90   : > { %p3333_p3 = pnand %p3331_p1, %p3627_p8 }
  0x92   : > { %p3334_p11 = pneg %p3333_p3 }
  0x94   : > { %p3339_p13 = pnand %p3337_p12, %p3334_p11 }
  0x96   : > { %3342 = shalt.err (!%p3339_p13)
}
  0x97   : > { %s3343_s14 = scalar_lea.vmem %s309_s1, 64  ;;  %p3351_p7 = scmp.lt.s32.totalorder %s309_s1, %s309_s1 }
  0x98   : > { %p3344_p0 = scmp.ne.s32.totalorder %s309_s1, %s3343_s14  ;;  %p3352_p9 = scmp.lt.s32.totalorder %s3343_s14, %s3343_s14 }
  0x9a   : > { %p3346_p2 = pnand %p3344_p0, %p3627_p8  ;;  %p3353_p4 = por %p3352_p9, %p3351_p7 }
  0x9c   : > { %p3347_p5 = pneg %p3346_p2 }
  0x9e   : > { %p3354_p10 = pnand %p3353_p4, %p3347_p5 }
  0xa0   : > { %3357 = shalt.err (!%p3354_p10)
}
  0xa1   : > { %3096 = dma.hbm_to_vmem [thread:$0]  (!%p3611_p6), %s4647_s6, 64, %s309_s1, [#allocation12]  }
  0xa2   : > { %s3358_s16 = scalar_lea.hbm %s4648_s7, 80 }
  0xa3   : > { %p3359_p1 = scmp.ne.s32.totalorder %s4648_s7, %s3358_s16  ;;  %p3365_p12 = scmp.lt.u32.totalorder %s3358_s16, %s4648_s7 }
  0xa5   : > { %p3361_p3 = pnand %p3359_p1, %p3627_p8 }
  0xa7   : > { %p3362_p11 = pneg %p3361_p3 }
  0xa9   : > { %p3367_p13 = pnand %p3365_p12, %p3362_p11 }
  0xab   : > { %3370 = shalt.err (!%p3367_p13)
}
  0xac   : > { %s3371_s10 = scalar_lea.vmem %s320_s21, 80  ;;  %s3378_s1 = scalar_lea.vmem %s320_s21, 96 }
  0xad   : > { %p3372_p0 = scmp.ne.s32.totalorder %s320_s21, %s3371_s10  ;;  %p3379_p7 = scmp.lt.s32.totalorder %s320_s21, %s320_s21 }
  0xae   : > { %p3380_p9 = scmp.lt.s32.totalorder %s3378_s1, %s3371_s10 }
  0xaf   : > { %p3374_p2 = pnand %p3372_p0, %p3627_p8 }
  0xb0   : > { %p3381_p4 = por %p3380_p9, %p3379_p7 }
  0xb1   : > { %p3375_p5 = pneg %p3374_p2 }
  0xb3   : > { %p3382_p10 = pnand %p3381_p4, %p3375_p5 }
  0xb5   : > { %3385 = shalt.err (!%p3382_p10)
}
  0xb6   : > { %3099 = dma.hbm_to_vmem [thread:$0]  (!%p3611_p6), %s4648_s7, 80, %s320_s21, [#allocation15]  }
  0xb7   : > { %s2873_s23 = sadd.s32 4294967294, %s3498_s30   ;;  %s3778_s15 = sadd.s32 1, %s3498_s30  }
  0xb8   : > { %s35_s20 = sadd.s32 1, %s3494_s29  ;;  %s32_s14 = ssub.s32 %s3498_s30, %s3778_s15 }
  0xb9   : > { %p42_p8 = scmp.ne.s32.totalorder %s3494_s29, %s3490_s28  ;;  %p33_p1 = scmp.eq.s32.totalorder %s32_s14, 0 }
  0xba   : > { %p43_p3 = scmp.eq.s32.totalorder %s3498_s30, 0  ;;  %p48_p11 = scmp.ne.s32.totalorder %s3490_s28, %s3486_s27 }
  0xbb   : > { %p219_p12 = scmp.eq.s32.totalorder %s3595_s11, 1  ;;  %p4664_p0 = scmp.eq.s32.totalorder %s3595_s11, 0 }
  0xbc   : > { %s3790_s19 = scalar_select %p33_p1, %s3494_s29, %s35_s20  }
  0xbd   : > { %p44_p13 = por %p43_p3, %p42_p8  ;;  %p3794_p2 = por %p4664_p0, %p48_p11 }
  0xbe   : > { %p3798_p6 = por %p219_p12, %p42_p8  ;;  %p225_p5 = scmp.eq.s32.totalorder %s2873_s23, 1 }
  0xbf   : > { %p3115_p7 = scmp.lt.s32.totalorder %s3498_s30, 2  ;;  %s330_s24 = sand.u32 1, %s3494_s29  }
  0xc0   : > { %s4666_s21 = scalar_select %p3798_p6, 1, 0 }
  0xc1   : > { %p3804_p9 = por %p225_p5, %p48_p11  ;;  %s3043_s16 = smul.u32 12, %s330_s24 }
  0xc2   : > { %p3808_p4 = pnand %p3115_p7, %p44_p13  ;;  %s3044_s22 = smul.u32 192, %s3498_s30 }
  0xc3   : > { %s4667_s13 = scalar_select %p3804_p9, 1, 0 }
  0xc4   : > { %s3816_s10 = scalar_lea.hbm %s4641_s0, %s3044_s22  ;;  %s334_s1 = scalar_lea.vmem [#allocation2], %s3043_s16 }
  0xc5   : > { %s342_s18 = sshll.u32 %s334_s1, 4  ;;  %s331_s17 = scalar_lea.sflag [#allocation3], %s330_s24  ;;  %s3818_s18 = int_to_ptr.vmem [resolvable:$true] %s342_s18 }
  0xc6   : > { %s3386_s23 = scalar_lea.hbm %s3816_s10, 192  ;;  %p3388_p8 = pneg %p3808_p4 }
  0xc7   : > { %p3387_p10 = scmp.ne.s32.totalorder %s3816_s10, %s3386_s23  ;;  %s3391_s22 = scalar_lea.hbm %s4641_s0, 384 }
  0xc8   : > { %p3392_p11 = scmp.lt.u32.totalorder %s3816_s10, %s4641_s0  ;;  %p3393_p12 = scmp.lt.u32.totalorder %s3391_s22, %s3386_s23 }
  0xc9   : > { %p3389_p1 = pnand %p3388_p8, %p3387_p10  ;;  %p3395_p0 = scmp.lt.u32.totalorder %s3386_s23, %s3816_s10 }
  0xca   : > { %p3394_p13 = por %p3393_p12, %p3392_p11 }
  0xcb   : > { %p3390_p3 = pneg %p3389_p1 }
  0xcc   : > { %p3396_p5 = por %p3395_p0, %p3394_p13 }
  0xce   : > { %p3397_p7 = pnand %p3396_p5, %p3390_p3 }
  0xd0   : > { %3400 = shalt.err (!%p3397_p7)
}
  0xd1   : > { %s3401_s24 = scalar_lea.vmem %s3818_s18, 192  ;;  %s3511_s16 = smov [#allocation2]  }
  0xd2   : > { %p3402_p10 = scmp.ne.s32.totalorder %s3818_s18, %s3401_s24  ;;  %s3406_s1 = sshll.u32 %s3511_s16, 4  ;;  %s3407_s1 = int_to_ptr.vmem [resolvable:$false] %s3406_s1 }
  0xd3   : > { %s3408_s20 = scalar_lea.vmem %s3407_s1, 384  ;;  %p3409_p6 = scmp.lt.s32.totalorder %s3818_s18, %s3407_s1 }
  0xd4   : > { %p3404_p1 = pnand %p3402_p10, %p3388_p8  ;;  %p3410_p11 = scmp.lt.s32.totalorder %s3408_s20, %s3401_s24 }
  0xd6   : > { %p3405_p9 = pneg %p3404_p1  ;;  %p3411_p12 = por %p3410_p11, %p3409_p6 }
  0xd8   : > { %p3412_p13 = pnand %p3411_p12, %p3405_p9 }
  0xda   : > { %3415 = shalt.err (!%p3412_p13)
}
  0xdb   : > { %3103 = dma.hbm_to_vmem [thread:$0]  (!%p3808_p4), %s3816_s10, 192, %s3818_s18, %s331_s17  }
  0xdc   : > { %p4669_p3 = scmp.ne.s32.totalorder %s4657_s12, 0 }
  0xdd   : > { %s3848_s23 = sand.u32 (!%p4669_p3), 1, %s3490_s28  }
  0xde   : > { %351 = sbr.rel (%p4669_p3) target bundleno = 1434 (0x59a), region = 52  ;;  %s354_s22 = scalar_lea.sflag (!%p4669_p3), [#allocation3], %s3848_s23 }
  0xdf   : > { %s3045_s14 = smul.u32 (!%p4669_p3), 12, %s3848_s23 }
  0xe1   : > { %s3852_s25 = scalar_lea.vmem (!%p4669_p3), [#allocation2], %s3045_s14 }
  0xe5   : > { %3461 = dma.done.wait (%p3794_p2), %s354_s22, 192  }
  0xe6   : > { %3463 = vsyncadd (%p3794_p2), %s354_s22, 4294967104  ;;  %p4670_p6 = scmp.eq.s32.totalorder %s3595_s11, 0 }
  0xe8   : > { %3465 = dma.done.wait (%p4670_p6), [#allocation6], 128   ;;  %p4671_p9 = pmov %p4670_p6 }
  0xe9   : > { %p4672_p4 = pmov %p4670_p6 }
  0xea   : > { %3467 = vsyncadd (%p4671_p9), [#allocation6], 4294967168 }
  0xeb   : > { %3469 = dma.done.wait (%p4672_p4), [#allocation9], 112   ;;  %p4673_p8 = pmov %p4672_p4 }
  0xec   : > { %p4674_p0 = pmov %p4672_p4 }
  0xed   : > { %3471 = vsyncadd (%p4673_p8), [#allocation9], 4294967184 }
  0xee   : > { %3473 = dma.done.wait (%p4674_p0), [#allocation12], 160   ;;  %p4675_p5 = pmov %p4674_p0 }
  0xef   : > { %p4676_p2 = pmov %p4674_p0 }
  0xf0   : > { %3475 = vsyncadd (%p4675_p5), [#allocation12], 4294967136 }
  0xf1   : > { %3477 = dma.done.wait (%p4676_p2), [#allocation15], 80   ;;  %p4677_p7 = pmov %p4674_p0 }
  0xf2   : > { %v444_v0 = vlaneseq  ;;  %v3512_v1 = vmov 1983009808   ;;  %v419_v6 = vld [vmem:[%s3852_s25] sm:$0xff]  ;;  %s3513_s12 = smov 127   ;;  %s3514_s26 = smov 126   ;;  %vm554_vm0 = vcmask 1014784  }
  0xf3   : > { %3479 = vsyncadd (%p4677_p7), [#allocation15], 4294967216  ;;  %v442_v2 = vunpack.c.l.s4 %v3512_v1  ;;  %v465_v8 = vcombine.low %v419_v6, %v419_v6  ;;  %v440_v10 = vcombine.high %v419_v6, %v419_v6  ;;  %v420_v16 = vld [vmem:[%s3852_s25 + $0x8] sm:$0xf]  ;;  %s3515_s3 = smov 125   ;;  %s3516_s10 = smov 124  }
  0xf4   : > { %v3874_v3 = vshrl.u32 %v444_v0, 7  ;;  %v474_v17 = vcombine.low %v420_v16, %v420_v16  ;;  %s3517_s18 = smov 106   ;;  %s3518_s17 = smov 86   ;;  %vm495_vm1 = vcmask 1039360   ;;  %vm516_vm2 = vcmask 1031168  }
  0xf5   : > { %v443_v4 = vunpack.c.0.s8 %v442_v2  ;;  %s3519_s9 = smov 66   ;;  %vm536_vm3 = vcmask 1022976   ;;  %vm560_vm4 = vcmask 1041408   ;;  %vm579_vm5 = vcmask 1043456   ;;  %s3521_s24 = smov 46  }
  0xf6   : > { %vm592_vm6 = vcmask 1045504   ;;  %s3522_s16 = smov 26   ;;  %vm635_vm7 = vcmask 703488   ;;  %vm651_vm8 = vcmask 162816   ;;  %vm816_vm9 = vcmask 867328   ;;  %s3525_s1 = smov 65  }
  0xf7   : > { %v446_v5 = vsub.s32 %v443_v4, %v3874_v3  ;;  %vm3524_vm10 = vmmov 0   ;;  %vm996_vm11 = vcmask 539648   ;;  %vm1181_vm12 = vcmask 375808   ;;  %s3526_s20 = smov 85   ;;  %s3527_s14 = smov 45  }
  0xf8   : > { %vm1366_vm13 = vcmask 211968   ;;  %vm1550_vm14 = vcmask 97280   ;;  %vm2038_vm15 = vcmask 31744   ;;  %s2892_s22 = sshll.u32 %s3848_s23, 4  ;;  %p4678_p1 = scmp.ne.s32.totalorder %s4666_s21, 0 }
  0xf9   : > { %v3878_v7 = vrot.slane %v419_v6, %v446_v5  ;;  %v472_v11 = vrot.slane %v465_v8, %v446_v5  ;;  %v3890_v12 = vrot.slane %v440_v10, %v446_v5  ;;  %v481_v19 = vrot.slane %v474_v17, %v446_v5 }
  0xfa   : > { %v3906_v21 = vrot.slane %v420_v16, %v446_v5  ;;  %v3520_v16 = vmov 0  }
  0xfb   : > { %487 = vrot.lane.b32.xlu0 %v3878_v7, %s3513_s12  ;;  %v3884_v9 = vcombine.high %v3878_v7, %v3878_v7  ;;  %v501_v13 = vcombine.low %v3878_v7, %v3878_v7  ;;  %v473_v14 = vcombine.high %v472_v11, %v472_v11  ;;  %v502_v15 = vcombine.low %v3890_v12, %v3890_v12 }
  0xfc   : > { %v522_v18 = vcombine.low %v472_v11, %v472_v11  ;;  %v482_v20 = vcombine.high %v481_v19, %v481_v19  ;;  %v3912_v22 = vcombine.high %v3890_v12, %v3890_v12  ;;  %v503_v23 = vcombine.low %v3906_v21, %v3906_v21  ;;  %702 = vmatprep.mubr.bf16.mxu0 %v3520_v16 }
  0xfd   : > { %489 = vrot.lane.b32.xlu1 %v3884_v9, %s3513_s12  ;;  %v523_v24 = vcombine.low %v481_v19, %v481_v19  ;;  %v3923_v25 = vcombine.high %v3906_v21, %v3906_v21  ;;  %743 = vmatprep.mubr.bf16.mxu1 %v3520_v16 }
  0xfe   : > { %3184 = vset.pattern.permute.xlu1 %v3520_v16  ;;  %3183 = vset.pattern.permute.xlu0 %v3520_v16 }
  0xff   : > { %506 = vrot.lane.b32.xlu0 %v3878_v7, %s3514_s26 }
 0x101   : > { %483 = vrot.lane.b32.xlu1 %v472_v11, %s3513_s12 }
 0x103   : > { %510 = vrot.lane.b32.xlu0 %v3890_v12, %s3514_s26 }
 0x105   : > { %504 = vrot.lane.b32.xlu1 %v501_v13, %s3514_s26 }
 0x107   : > { %485 = vrot.lane.b32.xlu0 %v473_v14, %s3513_s12 }
 0x109   : > { %508 = vrot.lane.b32.xlu1 %v502_v15, %s3514_s26 }
 0x10b   : > { %526 = vrot.lane.b32.xlu0 %v472_v11, %s3515_s3 }
 0x10d   : > { %528 = vrot.lane.b32.xlu1 %v501_v13, %s3515_s3 }
 0x10f   : > { %530 = vrot.lane.b32.xlu0 %v3878_v7, %s3515_s3 }
 0x111   : > { %524 = vrot.lane.b32.xlu1 %v522_v18, %s3515_s3 }
 0x113   : > { %491 = vrot.lane.b32.xlu0 %v481_v19, %s3513_s12 }
 0x115   : > { %493 = vrot.lane.b32.xlu1 %v482_v20, %s3513_s12 }
 0x117   : > { %542 = vrot.lane.b32.xlu0 %v3878_v7, %s3516_s10 }
 0x119   : > { %544 = vrot.lane.b32.xlu1 %v3884_v9, %s3516_s10 }
 0x11b   : > { %546 = vrot.lane.b32.xlu0 %v3890_v12, %s3516_s10 }
 0x11d   : > { %548 = vrot.lane.b32.xlu1 %v3912_v22, %s3516_s10 }
 0x11f   : > { %512 = vrot.lane.b32.xlu0 %v503_v23, %s3514_s26 }
 0x121   : > { %514 = vrot.lane.b32.xlu1 %v3906_v21, %s3514_s26 }
 0x123   : > { %532 = vrot.lane.b32.xlu0 %v523_v24, %s3515_s3 }
 0x125   : > { %534 = vrot.lane.b32.xlu1 %v481_v19, %s3515_s3 }
 0x127   : > { %550 = vrot.lane.b32.xlu0 %v3906_v21, %s3516_s10 }
 0x129   : > { %552 = vrot.lane.b32.xlu1 %v3923_v25, %s3516_s10 }
 0x16d   : > { %v3927_v26 = vpop.permute.xlu0 %487 }
 0x16f   : > { %v3929_v27 = vpop.permute.xlu1 %489 }
 0x170   : > { %v498_v0 = vsel %vm495_vm1, %v3927_v26, %v3929_v27 }
 0x171   : > { %v3931_v28 = vpop.permute.xlu0 %506  ;;  %v569_v4 = vsel %vm560_vm4, %v3890_v12, %v498_v0 }
 0x173   : > { %v3933_v29 = vpop.permute.xlu1 %483 }
 0x175   : > { %v3935_v30 = vpop.permute.xlu0 %510 }
 0x177   : > { %v3937_v31 = vpop.permute.xlu1 %504 }
 0x179   : > { %v3939_v32 = vpop.permute.xlu0 %485 }
 0x17a   : > { %v497_v8 = vsel %vm495_vm1, %v3939_v32, %v3927_v26  ;;  %v496_v12 = vsel %vm495_vm1, %v3933_v29, %v3939_v32 }
 0x17b   : > { %v3941_v33 = vpop.permute.xlu1 %508  ;;  %v566_v10 = vsel %vm560_vm4, %v3884_v9, %v497_v8  ;;  %v563_v14 = vsel %vm560_vm4, %v3878_v7, %v496_v12  ;;  %v517_v7 = vsel %vm516_vm2, %v3937_v31, %v3931_v28  ;;  %v435_v8 = vld [vmem:[#allocation10 + $0x4] sm:$0x3] }
 0x17c   : > { %v519_v1 = vsel %vm516_vm2, %v3941_v33, %v3935_v30  ;;  %v518_v11 = vsel %vm516_vm2, %v3931_v28, %v3941_v33  ;;  %v581_v18 = vsel %vm579_vm5, %v563_v14, %v517_v7 }
 0x17d   : > { %v3943_v34 = vpop.permute.xlu0 %526  ;;  %v585_v5 = vsel %vm579_vm5, %v569_v4, %v519_v1  ;;  %v583_v9 = vsel %vm579_vm5, %v566_v10, %v518_v11 }
 0x17f   : > { %v3945_v35 = vpop.permute.xlu1 %528 }
 0x180   : > { %v538_v13 = vsel %vm536_vm3, %v3943_v34, %v3945_v35 }
 0x181   : > { %v531_v36 = vpop.permute.xlu0 %530  ;;  %v4086_v15 = vsel %vm592_vm6, %v583_v9, %v538_v13 }
 0x182   : > { %v539_v2 = vsel %vm536_vm3, %v3945_v35, %v531_v36 }
 0x183   : > { %v3947_v37 = vpop.permute.xlu1 %524  ;;  %v4058_v6 = vsel %vm592_vm6, %v585_v5, %v539_v2  ;;  %v434_v2 = vld [vmem:[#allocation10 + $0x2] sm:$0x3] }
 0x184   : > { %v537_v17 = vsel %vm536_vm3, %v3947_v37, %v3943_v34  ;;  %v1529_v34 = vrot.slane %v4058_v6, 2 }
 0x185   : > { %v3949_v38 = vpop.permute.xlu0 %491  ;;  %v4107_v20 = vsel %vm592_vm6, %v581_v18, %v537_v17  ;;  %v422_v18 = vld [vmem:[#allocation5 + $0x1] sm:$0x1] }
 0x186   : > { %v499_v53 = vsel %vm495_vm1, %v3929_v27, %v3949_v38  ;;  %v1527_v31 = vrot.slane %v4107_v20, 2 }
 0x187   : > { %v3951_v39 = vpop.permute.xlu1 %493  ;;  %v572_v58 = vsel %vm560_vm4, %v3912_v22, %v499_v53 }
 0x188   : > { %v578_v61 = vsel %vm560_vm4, %v3923_v25, %v3951_v39  ;;  %v500_v19 = vsel %vm495_vm1, %v3949_v38, %v3951_v39 }
 0x189   : > { %v543_v40 = vpop.permute.xlu0 %542  ;;  %v575_v24 = vsel %vm560_vm4, %v3906_v21, %v500_v19 }
 0x18b   : > { %v545_v41 = vpop.permute.xlu1 %544 }
 0x18c   : > { %v3975_v51 = vsel %vm554_vm0, %v543_v40, %v545_v41 }
 0x18d   : > { %v547_v43 = vpop.permute.xlu0 %546 }
 0x18e   : > { %v3968_v49 = vsel %vm554_vm0, %v545_v41, %v547_v43 }
 0x18f   : > { %v549_v42 = vpop.permute.xlu1 %548 }
 0x190   : > { %v4001_v54 = vsel %vm554_vm0, %v547_v43, %v549_v42 }
 0x191   : > { %v3955_v45 = vpop.permute.xlu0 %512 }
 0x192   : > { %v520_v55 = vsel %vm516_vm2, %v3935_v30, %v3955_v45  ;;  %v1528_v30 = vrot.slane %v4086_v15, 2 }
 0x193   : > { %v3953_v44 = vpop.permute.xlu1 %514  ;;  %v587_v59 = vsel %vm579_vm5, %v572_v58, %v520_v55  ;;  %v2016_v55 = vrot.slane %v4086_v15, 4  ;;  %v2017_v58 = vrot.slane %v4058_v6, 4 }
 0x194   : > { %v591_v62 = vsel %vm579_vm5, %v578_v61, %v3953_v44  ;;  %v521_v22 = vsel %vm516_vm2, %v3955_v45, %v3953_v44 }
 0x195   : > { %v3961_v48 = vpop.permute.xlu0 %532  ;;  %v589_v25 = vsel %vm579_vm5, %v575_v24, %v521_v22  ;;  %vm2575_vm5 = vcmask 367616  }
 0x196   : > { %v540_v57 = vsel %vm536_vm3, %v531_v36, %v3961_v48 }
 0x197   : > { %v3957_v46 = vpop.permute.xlu1 %534  ;;  %v4019_v60 = vsel %vm592_vm6, %v587_v59, %v540_v57 }
 0x198   : > { %v4036_v63 = vsel %vm592_vm6, %v591_v62, %v3957_v46  ;;  %v541_v23 = vsel %vm536_vm3, %v3961_v48, %v3957_v46  ;;  %v1530_v35 = vrot.slane %v4019_v60, 2  ;;  %v2018_v59 = vrot.slane %v4019_v60, 4 }
 0x199   : > { %v551_v50 = vpop.permute.xlu0 %550  ;;  %v4123_v26 = vsel %vm592_vm6, %v589_v25, %v541_v23  ;;  %v1532_v39 = vrot.slane %v4036_v63, 2  ;;  %v2020_v1 = vrot.slane %v4036_v63, 4  ;;  %vm2463_vm3 = vcmask 695296  }
 0x19a   : > { %v4007_v56 = vsel %vm554_vm0, %v549_v42, %v551_v50  ;;  %v1531_v38 = vrot.slane %v4123_v26, 2  ;;  %v2019_v0 = vrot.slane %v4123_v26, 4 }
 0x19b   : > { %v3959_v47 = vpop.permute.xlu1 %552 }
 0x19c   : > { %814 = vrot.lane.b32.xlu0 %v3959_v47, %s3517_s18  ;;  %633 = vrot.lane.b32.xlu1 %v3959_v47, %s3518_s17  ;;  %v3979_v52 = vsel %vm554_vm0, %v551_v50, %v3959_v47  ;;  %vm2308_vm0 = vcmask 1040384  }
 0x1a0   : > { %625 = vrot.lane.b32.xlu0 %v3968_v49, %s3518_s17  ;;  %994 = vrot.lane.b32.xlu1 %v3959_v47, %s3519_s9 }
 0x1a4   : > { %631 = vrot.lane.b32.xlu0 %v3979_v52, %s3518_s17  ;;  %623 = vrot.lane.b32.xlu1 %v3975_v51, %s3518_s17 }
 0x1a8   : > { %806 = vrot.lane.b32.xlu0 %v3968_v49, %s3517_s18  ;;  %804 = vrot.lane.b32.xlu1 %v3975_v51, %s3517_s18 }
 0x1ac   : > { %986 = vrot.lane.b32.xlu0 %v3968_v49, %s3519_s9  ;;  %812 = vrot.lane.b32.xlu1 %v3979_v52, %s3517_s18 }
 0x1b0   : > { %992 = vrot.lane.b32.xlu0 %v3979_v52, %s3519_s9  ;;  %984 = vrot.lane.b32.xlu1 %v3975_v51, %s3519_s9 }
 0x1b4   : > { %810 = vrot.lane.b32.xlu0 %v4007_v56, %s3517_s18  ;;  %627 = vrot.lane.b32.xlu1 %v4001_v54, %s3518_s17 }
 0x1b8   : > { %629 = vrot.lane.b32.xlu1 %v4007_v56, %s3518_s17  ;;  %617 = vrot.lane.b32.xlu0 %v4019_v60, %s3518_s17 }
 0x1bc   : > { %808 = vrot.lane.b32.xlu1 %v4001_v54, %s3517_s18  ;;  %978 = vrot.lane.b32.xlu0 %v4019_v60, %s3519_s9 }
 0x1c0   : > { %988 = vrot.lane.b32.xlu1 %v4001_v54, %s3519_s9  ;;  %621 = vrot.lane.b32.xlu0 %v4036_v63, %s3518_s17 }
 0x1c4   : > { %990 = vrot.lane.b32.xlu1 %v4007_v56, %s3519_s9  ;;  %802 = vrot.lane.b32.xlu0 %v4036_v63, %s3517_s18 }
 0x1c8   : > { %798 = vrot.lane.b32.xlu1 %v4019_v60, %s3517_s18  ;;  %976 = vrot.lane.b32.xlu0 %v4058_v6, %s3519_s9 }
 0x1cc   : > { %615 = vrot.lane.b32.xlu1 %v4058_v6, %s3518_s17  ;;  %982 = vrot.lane.b32.xlu0 %v4036_v63, %s3519_s9 }
 0x1d0   : > { %796 = vrot.lane.b32.xlu1 %v4058_v6, %s3517_s18  ;;  %613 = vrot.lane.b32.xlu0 %v4086_v15, %s3518_s17 }
 0x1d4   : > { %1161 = vrot.lane.b32.xlu1 %v4058_v6, %s3521_s24  ;;  %611 = vrot.lane.b32.xlu0 %v4107_v20, %s3518_s17 }
 0x1d8   : > { %619 = vrot.lane.b32.xlu1 %v4123_v26, %s3518_s17  ;;  %1171 = vrot.lane.b32.xlu0 %v3968_v49, %s3521_s24 }
 0x1dc   : > { %1163 = vrot.lane.b32.xlu1 %v4019_v60, %s3521_s24  ;;  %794 = vrot.lane.b32.xlu0 %v4086_v15, %s3517_s18 }
 0x1e0   : > { %1169 = vrot.lane.b32.xlu1 %v3975_v51, %s3521_s24  ;;  %792 = vrot.lane.b32.xlu0 %v4107_v20, %s3517_s18 }
 0x1e4   : > { %1173 = vrot.lane.b32.xlu1 %v4001_v54, %s3521_s24  ;;  %800 = vrot.lane.b32.xlu0 %v4123_v26, %s3517_s18 }
 0x1e8   : > { %974 = vrot.lane.b32.xlu1 %v4086_v15, %s3519_s9  ;;  %1159 = vrot.lane.b32.xlu0 %v4086_v15, %s3521_s24 }
 0x1ec   : > { %972 = vrot.lane.b32.xlu1 %v4107_v20, %s3519_s9  ;;  %1157 = vrot.lane.b32.xlu0 %v4107_v20, %s3521_s24 }
 0x1f0   : > { %980 = vrot.lane.b32.xlu1 %v4123_v26, %s3519_s9  ;;  %1165 = vrot.lane.b32.xlu0 %v4123_v26, %s3521_s24 }
 0x1f4   : > { %1177 = vrot.lane.b32.xlu1 %v3979_v52, %s3521_s24  ;;  %1175 = vrot.lane.b32.xlu0 %v4007_v56, %s3521_s24 }
 0x1f8   : > { %1344 = vrot.lane.b32.xlu1 %v4086_v15, %s3522_s16  ;;  %1167 = vrot.lane.b32.xlu0 %v4036_v63, %s3521_s24 }
 0x1fc   : > { %1342 = vrot.lane.b32.xlu1 %v4107_v20, %s3522_s16  ;;  %1346 = vrot.lane.b32.xlu0 %v4058_v6, %s3522_s16 }
 0x200   : > { %1354 = vrot.lane.b32.xlu1 %v3975_v51, %s3522_s16  ;;  %1179 = vrot.lane.b32.xlu0 %v3959_v47, %s3521_s24 }
 0x204   : > { %1358 = vrot.lane.b32.xlu1 %v4001_v54, %s3522_s16  ;;  %1356 = vrot.lane.b32.xlu0 %v3968_v49, %s3522_s16  ;;  %v2015_v54 = vrot.slane %v4107_v20, 4  ;;  %v3523_v20 = vmov 0.0  }
 0x208   : > { %1350 = vrot.lane.b32.xlu1 %v4123_v26, %s3522_s16  ;;  %1348 = vrot.lane.b32.xlu0 %v4019_v60, %s3522_s16  ;;  %v433_v60 = vld [vmem:[#allocation10] sm:$0x3] }
 0x20c   : > { %1360 = vrot.lane.b32.xlu1 %v4007_v56, %s3522_s16  ;;  %1352 = vrot.lane.b32.xlu0 %v4036_v63, %s3522_s16 }
 0x20e   : > { %v4171_v21 = vpop.permute.xlu0 %814  ;;  %v4173_v27 = vpop.permute.xlu1 %633 }
 0x210   : > { %1364 = vrot.lane.b32.xlu1 %v3959_v47, %s3522_s16  ;;  %1362 = vrot.lane.b32.xlu0 %v3979_v52, %s3522_s16 }
 0x212   : > { %v4177_v28 = vpop.permute.xlu0 %625  ;;  %v4179_v29 = vpop.permute.xlu1 %994 }
 0x214   : > { %1535 = vrot.lane.b32.xlu1 %v1528_v30, %s3519_s9  ;;  %1533 = vrot.lane.b32.xlu0 %v1527_v31, %s3519_s9 }
 0x216   : > { %v4185_v32 = vpop.permute.xlu0 %631  ;;  %v4187_v33 = vpop.permute.xlu1 %623 }
 0x217   : > { %v641_v12 = vsel %vm635_vm7, %v4187_v33, %v4177_v28  ;;  %v645_v26 = vsel %vm635_vm7, %v4185_v32, %v4173_v27 }
 0x218   : > { %1537 = vrot.lane.b32.xlu0 %v1529_v34, %s3519_s9  ;;  %1539 = vrot.lane.b32.xlu1 %v1530_v35, %s3519_s9  ;;  %v656_v15 = vsel %vm560_vm4, %v641_v12, 0  ;;  %v668_v27 = vsel %vm560_vm4, %v645_v26, 0 }
 0x21a   : > { %v4193_v36 = vpop.permute.xlu0 %806  ;;  %v4195_v37 = vpop.permute.xlu1 %804 }
 0x21c   : > { %1541 = vrot.lane.b32.xlu0 %v1531_v38, %s3519_s9  ;;  %1543 = vrot.lane.b32.xlu1 %v1532_v39, %s3519_s9 }
 0x21e   : > { %v4201_v40 = vpop.permute.xlu0 %986  ;;  %v4203_v41 = vpop.permute.xlu1 %812 }
 0x220   : > { %1691 = vrot.lane.b32.xlu0 %v1527_v31, %s3518_s17  ;;  %1693 = vrot.lane.b32.xlu1 %v1528_v30, %s3518_s17 }
 0x222   : > { %v4207_v42 = vpop.permute.xlu0 %992  ;;  %v4209_v43 = vpop.permute.xlu1 %984 }
 0x224   : > { %1695 = vrot.lane.b32.xlu0 %v1529_v34, %s3518_s17  ;;  %1697 = vrot.lane.b32.xlu1 %v1530_v35, %s3518_s17 }
 0x226   : > { %v4213_v44 = vpop.permute.xlu0 %810  ;;  %v4215_v45 = vpop.permute.xlu1 %627 }
 0x227   : > { %v642_v13 = vsel %vm635_vm7, %v4177_v28, %v4215_v45 }
 0x228   : > { %1699 = vrot.lane.b32.xlu0 %v1531_v38, %s3518_s17  ;;  %1701 = vrot.lane.b32.xlu1 %v1532_v39, %s3518_s17  ;;  %s2722_s17 = scalar_lea.sflag [#allocation4], %s3848_s23 }
 0x22a   : > { %v630_v46 = vpop.permute.xlu1 %629  ;;  %v618_v47 = vpop.permute.xlu0 %617 }
 0x22b   : > { %v644_v19 = vsel %vm635_vm7, %v630_v46, %v4185_v32  ;;  %v643_v22 = vsel %vm635_vm7, %v4215_v45, %v630_v46  ;;  %v822_v32 = vsel %vm816_vm9, %v4195_v37, %v4193_v36 }
 0x22c   : > { %1848 = vrot.lane.b32.xlu0 %v1527_v31, %s3521_s24  ;;  %1850 = vrot.lane.b32.xlu1 %v1528_v30, %s3521_s24  ;;  %v662_v28 = vsel %vm560_vm4, %v643_v22, 0  ;;  %v836_v46 = vsel %vm560_vm4, %v822_v32, 0  ;;  %v424_v22 = vld [vmem:[#allocation5 + $0x3] sm:$0x1] }
 0x22e   : > { %v4221_v48 = vpop.permute.xlu1 %808  ;;  %v4223_v49 = vpop.permute.xlu0 %978 }
 0x230   : > { %1852 = vrot.lane.b32.xlu0 %v1529_v34, %s3521_s24  ;;  %1854 = vrot.lane.b32.xlu1 %v1530_v35, %s3521_s24  ;;  %v823_v35 = vsel %vm816_vm9, %v4193_v36, %v4221_v48  ;;  %v824_v36 = vsel %vm816_vm9, %v4221_v48, %v4213_v44  ;;  %v826_v48 = vsel %vm816_vm9, %v4203_v41, %v4171_v21 }
 0x231   : > { %v1002_v21 = vsel %vm996_vm11, %v4209_v43, %v4201_v40 }
 0x232   : > { %v4227_v50 = vpop.permute.xlu1 %988  ;;  %v622_v51 = vpop.permute.xlu0 %621 }
 0x234   : > { %1856 = vrot.lane.b32.xlu0 %v1531_v38, %s3521_s24  ;;  %1858 = vrot.lane.b32.xlu1 %v1532_v39, %s3521_s24 }
 0x236   : > { %v4231_v52 = vpop.permute.xlu1 %990  ;;  %v4233_v53 = vpop.permute.xlu0 %802 }
 0x238   : > { %2021 = vrot.lane.b32.xlu0 %v2015_v54, %s3519_s9  ;;  %2023 = vrot.lane.b32.xlu1 %v2016_v55, %s3519_s9 }
 0x23a   : > { %v4239_v56 = vpop.permute.xlu1 %798  ;;  %v4241_v57 = vpop.permute.xlu0 %976 }
 0x23b   : > { %v999_v43 = vsel %vm996_vm11, %v4241_v57, %v4223_v49 }
 0x23c   : > { %2025 = vrot.lane.b32.xlu0 %v2017_v58, %s3519_s9  ;;  %2027 = vrot.lane.b32.xlu1 %v2018_v59, %s3519_s9 }
 0x23e   : > { %v616_v61 = vpop.permute.xlu1 %615  ;;  %v4247_v62 = vpop.permute.xlu0 %982 }
 0x23f   : > { %v638_v7 = vsel %vm635_vm7, %v616_v61, %v618_v47 }
 0x240   : > { %2029 = vrot.lane.b32.xlu0 %v2019_v0, %s3519_s9  ;;  %2031 = vrot.lane.b32.xlu1 %v2020_v1, %s3519_s9 }
 0x242   : > { %v797_v4 = vpop.permute.xlu1 %796  ;;  %v614_v5 = vpop.permute.xlu0 %613 }
 0x243   : > { %v637_v6 = vsel %vm635_vm7, %v614_v5, %v616_v61  ;;  %v819_v37 = vsel %vm816_vm9, %v797_v4, %v4239_v56 }
 0x244   : > { %670 = vmatprep.subr.bf16.mxu0 %v637_v6  ;;  %2186 = vperm.xlu1 %3184, %v434_v2   ;;  %v423_v6 = vld [vmem:[#allocation5 + $0x2] sm:$0x1] }
 0x245   : > { %2012 = vperm.xlu0 %3183, %v433_v60   ;;  %v1005_v60 = vsel %vm996_vm11, %v4231_v52, %v4207_v42 }
 0x246   : > { %v4254_v10 = vpop.permute.xlu1 %1161  ;;  %v612_v11 = vpop.permute.xlu0 %611 }
 0x247   : > { %v636_v63 = vsel %vm635_vm7, %v612_v11, %v614_v5  ;;  %v1016_v5 = vsel %vm560_vm4, %v1002_v21, 0 }
 0x248   : > { %671 = vmatpush1.bf16.msra.mxu0 %v636_v63  ;;  %2206 = vperm.xlu1 %3184, %v435_v8  }
 0x249   : > { %2893 = vmatprep.subr.msk.bf16.mxu0 %vm560_vm4, %v642_v13 }
 0x24a   : > { %v620_v9 = vpop.permute.xlu1 %619  ;;  %v4264_v14 = vpop.permute.xlu0 %1171 }
 0x24b   : > { %v639_v17 = vsel %vm635_vm7, %v618_v47, %v620_v9  ;;  %v640_v25 = vsel %vm635_vm7, %v620_v9, %v622_v51  ;;  %v825_v47 = vsel %vm816_vm9, %v4213_v44, %v4203_v41  ;;  %v421_v51 = vld [vmem:[#allocation5] sm:$0x1]  ;;  %v1003_v41 = vsel %vm996_vm11, %v4201_v40, %v4227_v50 }
 0x24c   : > { %673 = vmatpush1.bf16.msra.mxu0 %v656_v15  ;;  %711 = vmatprep.subr.bf16.mxu1 %v639_v17  ;;  %v1004_v40 = vsel %vm996_vm11, %v4227_v50, %v4231_v52  ;;  %v1006_v52 = vsel %vm996_vm11, %v4207_v42, %v4179_v29 }
 0x24d   : > { %712 = vmatpush1.bf16.msra.mxu1 %v638_v7  ;;  %2979 = vmatprep.subr.bf16.mxu0 %v3523_v20  ;;  %v1028_v13 = vsel %vm560_vm4, %v1006_v52, 0 }
 0x24e   : > { %v4274_v23 = vpop.permute.xlu1 %1163  ;;  %2895 = vmatprep.subr.msk.bf16.mxu1 %vm560_vm4, %v644_v19  ;;  %v795_v24 = vpop.permute.xlu0 %794 }
 0x24f   : > { %2894 = vmatmul.mubr.msk.bf16.vlgmr.msra.gmra.mrb[0].mxu0 %vm651_vm8, %v422_v18  ;;  %v818_v30 = vsel %vm816_vm9, %v795_v24, %v797_v4  ;;  %v1184_v7 = vsel %vm1181_vm12, %v4254_v10, %v4274_v23 }
 0x250   : > { %2980 = vmatpush3.bf16.msra.mxu0 %v640_v25  ;;  %2983 = vmatprep.mubr.msk.bf16.mxu0 %vm3524_vm10, %v3523_v20 }
 0x251   : > { %714 = vmatpush1.bf16.msra.mxu1 %v662_v28  ;;  %2981 = vmatprep.subr.bf16.mxu0 %v3523_v20 }
 0x252   : > { %v4287_v31 = vpop.permute.xlu1 %1169  ;;  %850 = vmatprep.subr.bf16.mxu1 %v818_v30  ;;  %v793_v33 = vpop.permute.xlu0 %792 }
 0x253   : > { %v817_v34 = vsel %vm816_vm9, %v793_v33, %v795_v24  ;;  %v1187_v29 = vsel %vm1181_vm12, %v4287_v31, %v4264_v14 }
 0x254   : > { %2896 = vmatmul.mubr.msk.bf16.vlgmr.msra.gmra.mrb[0].mxu1 %vm651_vm8, %v422_v18  ;;  %2982 = vmatpush3.bf16.msra.mxu0 %v668_v27 }
 0x255   : > { %851 = vmatpush1.bf16.msra.mxu1 %v817_v34  ;;  %882 = vmatprep.mubr.bf16.mxu1 %v3520_v16 }
 0x256   : > { %v4299_v38 = vpop.permute.xlu1 %1173  ;;  %2898 = vmatprep.subr.msk.bf16.mxu1 %vm560_vm4, %v823_v35  ;;  %v801_v39 = vpop.permute.xlu0 %800 }
 0x257   : > { %2984 = vmatmul.mubr.msk.bf16.vlgmr.msra.gmra.mrb[4].mxu0 %vm651_vm8, %v422_v18  ;;  %v820_v45 = vsel %vm816_vm9, %v4239_v56, %v801_v39  ;;  %v842_v56 = vsel %vm560_vm4, %v824_v36, 0  ;;  %v821_v58 = vsel %vm816_vm9, %v801_v39, %v4233_v53  ;;  %v848_v53 = vsel %vm560_vm4, %v826_v48, 0 }
 0x258   : > { %891 = vmatprep.subr.bf16.mxu0 %v820_v45  ;;  %923 = vmatprep.mubr.bf16.mxu0 %v3520_v16  ;;  %v1188_v42 = vsel %vm1181_vm12, %v4264_v14, %v4299_v38  ;;  %v1201_v18 = vsel %vm560_vm4, %v1187_v29, 0  ;;  %v426_v29 = vld [vmem:[#allocation7] sm:$0x1] }
 0x259   : > { %853 = vmatpush1.bf16.msra.mxu1 %v836_v46  ;;  %892 = vmatpush1.bf16.msra.mxu0 %v819_v37  ;;  %v425_v37 = vld [vmem:[#allocation5 + $0x4] sm:$0x1] }
 0x25a   : > { %v975_v54 = vpop.permute.xlu1 %974  ;;  %2900 = vmatprep.subr.msk.bf16.mxu0 %vm560_vm4, %v825_v47  ;;  %v1160_v55 = vpop.permute.xlu0 %1159  ;;  %2987 = vmatprep.subr.bf16.mxu1 %v3523_v20 }
 0x25b   : > { %v998_v44 = vsel %vm996_vm11, %v975_v54, %v4241_v57  ;;  %v1183_v57 = vsel %vm1181_vm12, %v1160_v55, %v4254_v10 }
 0x25c   : > { %2899 = vmatmul.mubr.msk.bf16.vlgmr.msra.gmra.mrb[4].mxu1 %vm651_vm8, %v421_v51 }
 0x25d   : > { %894 = vmatpush1.bf16.msra.mxu0 %v842_v56  ;;  %2988 = vmatpush3.bf16.msra.mxu1 %v821_v58 }
 0x25e   : > { %v973_v59 = vpop.permute.xlu1 %972  ;;  %1030 = vmatprep.subr.bf16.mxu0 %v998_v44  ;;  %v1158_v61 = vpop.permute.xlu0 %1157  ;;  %2989 = vmatprep.subr.bf16.mxu1 %v3523_v20 }
 0x25f   : > { %v997_v0 = vsel %vm996_vm11, %v973_v59, %v975_v54  ;;  %2991 = vmatprep.mubr.msk.bf16.mxu1 %vm3524_vm10, %v3523_v20 }
 0x260   : > { %2901 = vmatmul.mubr.msk.bf16.vlgmr.msra.gmra.mrb[8].mxu0 %vm651_vm8, %v421_v51 }
 0x261   : > { %2990 = vmatpush3.bf16.msra.mxu1 %v848_v53  ;;  %1031 = vmatpush1.bf16.msra.mxu0 %v997_v0 }
 0x262   : > { %v981_v1 = vpop.permute.xlu1 %980  ;;  %2903 = vmatprep.subr.msk.bf16.mxu0 %vm560_vm4, %v1003_v41  ;;  %v1166_v2 = vpop.permute.xlu0 %1165  ;;  %1062 = vmatprep.mubr.bf16.mxu0 %v3520_v16 }
 0x263   : > { %v1000_v4 = vsel %vm996_vm11, %v4223_v49, %v981_v1  ;;  %v1022_v49 = vsel %vm560_vm4, %v1004_v40, 0  ;;  %v1001_v50 = vsel %vm996_vm11, %v981_v1, %v4247_v62  ;;  %v1182_v62 = vsel %vm1181_vm12, %v1158_v61, %v1160_v55 }
 0x264   : > { %2992 = vmatmul.mubr.msk.bf16.vlgmr.msra.gmra.mrb[8].mxu1 %vm651_vm8, %v421_v51  ;;  %1071 = vmatprep.subr.bf16.mxu1 %v1000_v4  ;;  %v1185_v9 = vsel %vm1181_vm12, %v4274_v23, %v1166_v2 }
 0x265   : > { %1033 = vmatpush1.bf16.msra.mxu0 %v1016_v5  ;;  %1072 = vmatpush1.bf16.msra.mxu1 %v999_v43  ;;  %v427_v5 = vld [vmem:[#allocation7 + $0x1] sm:$0x1] }
 0x266   : > { %v1178_v8 = vpop.permute.xlu1 %1177  ;;  %2905 = vmatprep.subr.msk.bf16.mxu1 %vm560_vm4, %v1005_v60  ;;  %v1176_v11 = vpop.permute.xlu0 %1175  ;;  %2995 = vmatprep.subr.bf16.mxu0 %v3523_v20 }
 0x267   : > { %1103 = vmatprep.mubr.bf16.mxu1 %v3520_v16  ;;  %v1189_v14 = vsel %vm1181_vm12, %v4299_v38, %v1176_v11  ;;  %v1190_v19 = vsel %vm1181_vm12, %v1176_v11, %v1178_v8 }
 0x268   : > { %2904 = vmatmul.mubr.msk.bf16.vlgmr.msra.gmra.mrb[12].mxu0 %vm651_vm8, %v423_v6  ;;  %v1207_v10 = vsel %vm560_vm4, %v1189_v14, 0 }
 0x269   : > { %1074 = vmatpush1.bf16.msra.mxu1 %v1022_v49  ;;  %2996 = vmatpush3.bf16.msra.mxu0 %v1001_v50 }
 0x26a   : > { %v1345_v63 = vpop.permute.xlu1 %1344  ;;  %1215 = vmatprep.subr.bf16.mxu1 %v1183_v57  ;;  %v1168_v12 = vpop.permute.xlu0 %1167  ;;  %2997 = vmatprep.subr.bf16.mxu0 %v3523_v20 }
 0x26b   : > { %2999 = vmatprep.mubr.msk.bf16.mxu0 %vm3524_vm10, %v3523_v20  ;;  %v1186_v23 = vsel %vm1181_vm12, %v1166_v2, %v1168_v12 }
 0x26c   : > { %2906 = vmatmul.mubr.msk.bf16.vlgmr.msra.gmra.mrb[12].mxu1 %vm651_vm8, %v423_v6 }
 0x26d   : > { %2998 = vmatpush3.bf16.msra.mxu0 %v1028_v13  ;;  %1216 = vmatpush1.bf16.msra.mxu1 %v1182_v62 }
 0x26e   : > { %v1343_v15 = vpop.permute.xlu1 %1342  ;;  %2908 = vmatprep.subr.msk.bf16.mxu1 %vm560_vm4, %v1188_v42  ;;  %1256 = vmatprep.subr.bf16.mxu0 %v1185_v9  ;;  %v1347_v17 = vpop.permute.xlu0 %1346 }
 0x26f   : > { %1247 = vmatprep.mubr.bf16.mxu1 %v3520_v16  ;;  %v1368_v28 = vsel %vm1366_vm13, %v1345_v63, %v1347_v17  ;;  %v1367_v33 = vsel %vm1366_vm13, %v1343_v15, %v1345_v63 }
 0x270   : > { %3000 = vmatmul.mubr.msk.bf16.vlgmr.msra.gmra.mrb[16].mxu0 %vm651_vm8, %v423_v6 }
 0x271   : > { %1218 = vmatpush1.bf16.msra.mxu1 %v1201_v18  ;;  %1257 = vmatpush1.bf16.msra.mxu0 %v1184_v7 }
 0x272   : > { %v1355_v24 = vpop.permute.xlu1 %1354  ;;  %2910 = vmatprep.subr.msk.bf16.mxu0 %vm560_vm4, %v1190_v19  ;;  %v1180_v25 = vpop.permute.xlu0 %1179  ;;  %3003 = vmatprep.subr.bf16.mxu1 %v3523_v20 }
 0x273   : > { %1288 = vmatprep.mubr.bf16.mxu0 %v3520_v16  ;;  %v1191_v26 = vsel %vm1181_vm12, %v1178_v8, %v1180_v25 }
 0x274   : > { %2909 = vmatmul.mubr.msk.bf16.vlgmr.msra.gmra.mrb[16].mxu1 %vm651_vm8, %v424_v22  ;;  %v1213_v34 = vsel %vm560_vm4, %v1191_v26, 0 }
 0x275   : > { %1259 = vmatpush1.bf16.msra.mxu0 %v1207_v10  ;;  %3004 = vmatpush3.bf16.msra.mxu1 %v1186_v23 }
 0x276   : > { %v1359_v30 = vpop.permute.xlu1 %1358  ;;  %1400 = vmatprep.subr.bf16.mxu0 %v1368_v28  ;;  %v1357_v31 = vpop.permute.xlu0 %1356  ;;  %3005 = vmatprep.subr.bf16.mxu1 %v3523_v20  ;;  %v428_v28 = vld [vmem:[#allocation7 + $0x2] sm:$0x1] }
 0x277   : > { %3007 = vmatprep.mubr.msk.bf16.mxu1 %vm3524_vm10, %v3523_v20  ;;  %v1372_v27 = vsel %vm1366_vm13, %v1355_v24, %v1357_v31  ;;  %v1373_v32 = vsel %vm1366_vm13, %v1357_v31, %v1359_v30 }
 0x278   : > { %2911 = vmatmul.mubr.msk.bf16.vlgmr.msra.gmra.mrb[20].mxu0 %vm651_vm8, %v424_v22  ;;  %v1386_v46 = vsel %vm560_vm4, %v1372_v27, 0 }
 0x279   : > { %3006 = vmatpush3.bf16.msra.mxu1 %v1213_v34  ;;  %1401 = vmatpush1.bf16.msra.mxu0 %v1367_v33 }
 0x27a   : > { %v1351_v35 = vpop.permute.xlu1 %1350  ;;  %2913 = vmatprep.subr.msk.bf16.mxu0 %vm560_vm4, %v1373_v32  ;;  %v1349_v38 = vpop.permute.xlu0 %1348  ;;  %1432 = vmatprep.mubr.bf16.mxu0 %v3520_v16 }
 0x27b   : > { %v1369_v39 = vsel %vm1366_vm13, %v1347_v17, %v1349_v38  ;;  %v1370_v45 = vsel %vm1366_vm13, %v1349_v38, %v1351_v35 }
 0x27c   : > { %3008 = vmatmul.mubr.msk.bf16.vlgmr.msra.gmra.mrb[20].mxu1 %vm651_vm8, %v424_v22  ;;  %1441 = vmatprep.subr.bf16.mxu1 %v1370_v45 }
 0x27d   : > { %1403 = vmatpush1.bf16.msra.mxu0 %v1386_v46  ;;  %1442 = vmatpush1.bf16.msra.mxu1 %v1369_v39 }
 0x27e   : > { %v1361_v36 = vpop.permute.xlu1 %1360  ;;  %v1353_v47 = vpop.permute.xlu0 %1352  ;;  %3011 = vmatprep.subr.bf16.mxu0 %v3523_v20  ;;  %1473 = vmatprep.mubr.bf16.mxu1 %v3520_v16 }
 0x27f   : > { %v1371_v51 = vsel %vm1366_vm13, %v1351_v35, %v1353_v47  ;;  %v1374_v54 = vsel %vm1366_vm13, %v1359_v30, %v1361_v36 }
 0x280   : > { %2914 = vmatmul.mubr.msk.bf16.vlgmr.msra.gmra.mrb[24].mxu0 %vm651_vm8, %v425_v37  ;;  %v1392_v44 = vsel %vm560_vm4, %v1374_v54, 0 }
 0x281   : > { %3012 = vmatpush3.bf16.msra.mxu0 %v1371_v51  ;;  %3015 = vmatprep.mubr.msk.bf16.mxu0 %vm3524_vm10, %v3523_v20  ;;  %v429_v51 = vld [vmem:[#allocation8] sm:$0x1] }
 0x282   : > { %v1365_v55 = vpop.permute.xlu1 %1364  ;;  %v1363_v56 = vpop.permute.xlu0 %1362  ;;  %3013 = vmatprep.subr.bf16.mxu0 %v3523_v20 }
 0x283   : > { %v1375_v58 = vsel %vm1366_vm13, %v1361_v36, %v1363_v56  ;;  %v1376_v48 = vsel %vm1366_vm13, %v1363_v56, %v1365_v55 }
 0x284   : > { %v1398_v59 = vsel %vm560_vm4, %v1376_v48, 0  ;;  %2915 = vmatprep.subr.msk.bf16.mxu1 %vm560_vm4, %v1375_v58 }
 0x285   : > { %1444 = vmatpush1.bf16.msra.mxu1 %v1392_v44  ;;  %3014 = vmatpush3.bf16.msra.mxu0 %v1398_v59 }
 0x286   : > { %v1536_v61 = vpop.permute.xlu1 %1535  ;;  %v1534_v0 = vpop.permute.xlu0 %1533 }
 0x287   : > { %v1545_v53 = vsel %vm996_vm11, %v1534_v0, %v1536_v61 }
 0x288   : > { %2916 = vmatmul.mubr.msk.bf16.vlgmr.msra.gmra.mrb[24].mxu1 %vm651_vm8, %v425_v37  ;;  %3016 = vmatmul.mubr.msk.bf16.vlgmr.msra.gmra.mrb[28].mxu0 %vm651_vm8, %v425_v37  ;;  %v1555_v2 = vsel %vm592_vm6, %v1545_v53, 0 }
 0x289   : > { %1601 = vmatprep.mubr.bf16.mxu1 %v3520_v16  ;;  %1642 = vmatprep.mubr.bf16.mxu0 %v3520_v16 }
 0x28a   : > { %v1538_v21 = vpop.permute.xlu0 %1537  ;;  %v1540_v41 = vpop.permute.xlu1 %1539 }
 0x28b   : > { %v1546_v1 = vsel %vm996_vm11, %v1536_v61, %v1538_v21  ;;  %v1547_v4 = vsel %vm996_vm11, %v1538_v21, %v1540_v41 }
 0x28c   : > { %2918 = vmatprep.subr.msk.bf16.mxu1 %vm592_vm6, %v1546_v1  ;;  %v1561_v8 = vsel %vm592_vm6, %v1547_v4, 0 }
 0x28d   : > { %1570 = vmatpush1.bf16.msra.mxu1 %v1555_v2 }
 0x28e   : > { %v1542_v43 = vpop.permute.xlu0 %1541  ;;  %v1544_v40 = vpop.permute.xlu1 %1543  ;;  %3019 = vmatprep.subr.bf16.mxu1 %v3523_v20 }
 0x28f   : > { %v1548_v60 = vsel %vm996_vm11, %v1540_v41, %v1542_v43  ;;  %v1549_v6 = vsel %vm996_vm11, %v1542_v43, %v1544_v40 }
 0x290   : > { %v1567_v11 = vsel %vm592_vm6, %v1549_v6, 0  ;;  %2919 = vmatmul.mubr.msk.bf16.vlgmr.msra.gmra.mrb[28].mxu1 %vm1550_vm14, %v427_v5  ;;  %2920 = vmatprep.subr.msk.bf16.mxu0 %vm592_vm6, %v1548_v60 }
 0x291   : > { %1611 = vmatpush1.bf16.msra.mxu0 %v1561_v8  ;;  %3020 = vmatpush3.bf16.msra.mxu1 %v1567_v11 }
 0x292   : > { %v1692_v49 = vpop.permute.xlu0 %1691  ;;  %v1694_v50 = vpop.permute.xlu1 %1693  ;;  %3021 = vmatprep.mubr.msk.bf16.mxu1 %vm3524_vm10, %v3523_v20 }
 0x293   : > { %v1703_v52 = vsel %vm635_vm7, %v1692_v49, %v1694_v50 }
 0x294   : > { %2921 = vmatmul.mubr.msk.bf16.vlgmr.msra.gmra.mrb[32].mxu0 %vm1550_vm14, %v427_v5  ;;  %v1712_v62 = vsel %vm592_vm6, %v1703_v52, 0 }
 0x295   : > { %1758 = vmatprep.mubr.bf16.mxu0 %v3520_v16 }
 0x296   : > { %v1696_v57 = vpop.permute.xlu0 %1695  ;;  %v1698_v63 = vpop.permute.xlu1 %1697 }
 0x297   : > { %v1704_v12 = vsel %vm635_vm7, %v1694_v50, %v1696_v57  ;;  %v1705_v13 = vsel %vm635_vm7, %v1696_v57, %v1698_v63 }
 0x298   : > { %3022 = vmatmul.mubr.msk.bf16.vlgmr.msra.gmra.mrb[32].mxu1 %vm1550_vm14, %v427_v5  ;;  %2923 = vmatprep.subr.msk.bf16.mxu0 %vm592_vm6, %v1704_v12  ;;  %v1718_v7 = vsel %vm592_vm6, %v1705_v13, 0 }
 0x299   : > { %1727 = vmatpush1.bf16.msra.mxu0 %v1712_v62  ;;  %1799 = vmatprep.mubr.bf16.mxu1 %v3520_v16 }
 0x29a   : > { %v1700_v42 = vpop.permute.xlu0 %1699  ;;  %v1702_v9 = vpop.permute.xlu1 %1701  ;;  %3025 = vmatprep.subr.bf16.mxu0 %v3523_v20 }
 0x29b   : > { %v1706_v15 = vsel %vm635_vm7, %v1698_v63, %v1700_v42  ;;  %v1707_v17 = vsel %vm635_vm7, %v1700_v42, %v1702_v9 }
 0x29c   : > { %v1724_v18 = vsel %vm592_vm6, %v1707_v17, 0  ;;  %2924 = vmatmul.mubr.msk.bf16.vlgmr.msra.gmra.mrb[36].mxu0 %vm1550_vm14, %v426_v29  ;;  %2925 = vmatprep.subr.msk.bf16.mxu1 %vm592_vm6, %v1706_v15 }
 0x29d   : > { %1768 = vmatpush1.bf16.msra.mxu1 %v1718_v7  ;;  %3026 = vmatpush3.bf16.msra.mxu0 %v1724_v18 }
 0x29e   : > { %v1849_v14 = vpop.permute.xlu0 %1848  ;;  %v1851_v19 = vpop.permute.xlu1 %1850  ;;  %3027 = vmatprep.mubr.msk.bf16.mxu0 %vm3524_vm10, %v3523_v20 }
 0x29f   : > { %v1860_v22 = vsel %vm1181_vm12, %v1849_v14, %v1851_v19 }
 0x2a0   : > { %2926 = vmatmul.mubr.msk.bf16.vlgmr.msra.gmra.mrb[36].mxu1 %vm1550_vm14, %v426_v29  ;;  %v1869_v23 = vsel %vm592_vm6, %v1860_v22, 0 }
 0x2a1   : > { %1915 = vmatprep.mubr.bf16.mxu1 %v3520_v16 }
 0x2a2   : > { %v1853_v24 = vpop.permute.xlu0 %1852  ;;  %v1855_v25 = vpop.permute.xlu1 %1854 }
 0x2a3   : > { %v1861_v10 = vsel %vm1181_vm12, %v1851_v19, %v1853_v24  ;;  %v1862_v26 = vsel %vm1181_vm12, %v1853_v24, %v1855_v25 }
 0x2a4   : > { %3028 = vmatmul.mubr.msk.bf16.vlgmr.msra.gmra.mrb[40].mxu0 %vm1550_vm14, %v426_v29  ;;  %2928 = vmatprep.subr.msk.bf16.mxu1 %vm592_vm6, %v1861_v10  ;;  %v1875_v27 = vsel %vm592_vm6, %v1862_v26, 0 }
 0x2a5   : > { %1884 = vmatpush1.bf16.msra.mxu1 %v1869_v23  ;;  %1956 = vmatprep.mubr.bf16.mxu0 %v3520_v16 }
 0x2a6   : > { %v1857_v30 = vpop.permute.xlu0 %1856  ;;  %v1859_v31 = vpop.permute.xlu1 %1858  ;;  %3031 = vmatprep.subr.bf16.mxu1 %v3523_v20 }
 0x2a7   : > { %v1863_v33 = vsel %vm1181_vm12, %v1855_v25, %v1857_v30  ;;  %v1864_v34 = vsel %vm1181_vm12, %v1857_v30, %v1859_v31 }
 0x2a8   : > { %v1881_v32 = vsel %vm592_vm6, %v1864_v34, 0  ;;  %2929 = vmatmul.mubr.msk.bf16.vlgmr.msra.gmra.mrb[40].mxu1 %vm1550_vm14, %v428_v28  ;;  %2930 = vmatprep.subr.msk.bf16.mxu0 %vm592_vm6, %v1863_v33 }
 0x2a9   : > { %1925 = vmatpush1.bf16.msra.mxu0 %v1875_v27  ;;  %3032 = vmatpush3.bf16.msra.mxu1 %v1881_v32 }
 0x2aa   : > { %v2022_v35 = vpop.permute.xlu0 %2021  ;;  %v2024_v38 = vpop.permute.xlu1 %2023  ;;  %3033 = vmatprep.mubr.msk.bf16.mxu1 %vm3524_vm10, %v3523_v20 }
 0x2ab   : > { %v2033_v39 = vsel %vm996_vm11, %v2022_v35, %v2024_v38 }
 0x2ac   : > { %2931 = vmatmul.mubr.msk.bf16.vlgmr.msra.gmra.mrb[44].mxu0 %vm1550_vm14, %v428_v28  ;;  %v2043_v36 = vsel %vm560_vm4, %v2033_v39, 0 }
 0x2ad   : > { %2089 = vmatprep.mubr.bf16.mxu0 %v3520_v16 }
 0x2ae   : > { %v2026_v45 = vpop.permute.xlu0 %2025  ;;  %v2028_v46 = vpop.permute.xlu1 %2027 }
 0x2af   : > { %v2034_v37 = vsel %vm996_vm11, %v2024_v38, %v2026_v45  ;;  %v2035_v47 = vsel %vm996_vm11, %v2026_v45, %v2028_v46 }
 0x2b0   : > { %3034 = vmatmul.mubr.msk.bf16.vlgmr.msra.gmra.mrb[44].mxu1 %vm1550_vm14, %v428_v28  ;;  %2933 = vmatprep.subr.msk.bf16.mxu0 %vm560_vm4, %v2034_v37  ;;  %v2049_v48 = vsel %vm560_vm4, %v2035_v47, 0 }
 0x2b1   : > { %2058 = vmatpush1.bf16.msra.mxu0 %v2043_v36  ;;  %2130 = vmatprep.mubr.bf16.mxu1 %v3520_v16 }
 0x2b2   : > { %v2030_v54 = vpop.permute.xlu0 %2029  ;;  %v2032_v55 = vpop.permute.xlu1 %2031  ;;  %3037 = vmatprep.subr.bf16.mxu0 %v3523_v20 }
 0x2b3   : > { %v2036_v56 = vsel %vm996_vm11, %v2028_v46, %v2030_v54  ;;  %v2037_v58 = vsel %vm996_vm11, %v2030_v54, %v2032_v55 }
 0x2b4   : > { %v2055_v44 = vsel %vm560_vm4, %v2037_v58, 0  ;;  %2934 = vmatmul.mubr.msk.bf16.vlgmr.msra.gmra.mrb[48].mxu0 %vm2038_vm15, %v429_v51  ;;  %2935 = vmatprep.subr.msk.bf16.mxu1 %vm560_vm4, %v2036_v56 }
 0x2b5   : > { %2099 = vmatpush1.bf16.msra.mxu1 %v2049_v48  ;;  %3038 = vmatpush3.bf16.msra.mxu0 %v2055_v44 }
 0x2b6   : > { %3039 = vmatprep.mubr.msk.bf16.mxu0 %vm3524_vm10, %v3523_v20 }
 0x2b8   : > { %2936 = vmatmul.mubr.msk.bf16.vlgmr.msra.gmra.mrb[48].mxu1 %vm2038_vm15, %v429_v51 }
 0x2b9   : > { %2403 = vmatprep.mubr.bf16.mxu1 %v3520_v16 }
 0x2bc   : > { %3040 = vmatmul.mubr.msk.bf16.vlgmr.msra.gmra.mrb[52].mxu0 %vm2038_vm15, %v429_v51 }
 0x2bd   : > { %2444 = vmatprep.mubr.bf16.mxu0 %v3520_v16 }
 0x322   : > { %v704_v59 = vpop.f32.mrb[0].mxu0 }
 0x323   : > { %v706_v61 = vpop.f32.mrb[1].mxu0 }
 0x324   : > { %v708_v0 = vpop.f32.mrb[2].mxu0 }
 0x325   : > { %v709_v53 = vpop.f32.mrb[3].mxu0 }
 0x327   : > { %v745_v21 = vpop.f32.mrb[0].mxu1 }
 0x328   : > { %v747_v41 = vpop.f32.mrb[1].mxu1 }
 0x329   : > { %v749_v1 = vpop.f32.mrb[2].mxu1 }
 0x32a   : > { %v750_v2 = vpop.f32.mrb[3].mxu1  ;;  %v786_v4 = vpop.f32.mrb[4].mxu0 }
 0x32b   : > { %v2985_v5 = vpop.f32.mrb[5].mxu0 }
 0x32c   : > { %v789_v43 = vpop.f32.mrb[6].mxu0 }
 0x32d   : > { %v2986_v20 = vpop.f32.mrb[7].mxu0 }
 0x32f   : > { %v884_v40 = vpop.f32.mrb[4].mxu1 }
 0x330   : > { %v885_v60 = vadd.f32 %v884_v40, %v704_v59  ;;  %v886_v6 = vpop.f32.mrb[5].mxu1 }
 0x331   : > { %v887_v8 = vadd.f32 %v886_v6, %v706_v61  ;;  %v888_v11 = vpop.f32.mrb[6].mxu1 }
 0x332   : > { %v889_v49 = vpop.f32.mrb[7].mxu1 }
 0x333   : > { %v925_v50 = vpop.f32.mrb[8].mxu0 }
 0x334   : > { %v926_v52 = vadd.f32 %v925_v50, %v745_v21  ;;  %v927_v57 = vpop.f32.mrb[9].mxu0 }
 0x335   : > { %v928_v63 = vadd.f32 %v927_v57, %v747_v41  ;;  %v929_v12 = vpop.f32.mrb[10].mxu0 }
 0x336   : > { %v930_v62 = vpop.f32.mrb[11].mxu0 }
 0x337   : > { %v966_v13 = vpop.f32.mrb[8].mxu1 }
 0x338   : > { %v967_v29 = vadd.f32 %v966_v13, %v786_v4  ;;  %v2993_v42 = vpop.f32.mrb[9].mxu1 }
 0x339   : > { %v969_v9 = vpop.f32.mrb[10].mxu1 }
 0x33a   : > { %v2994_v15 = vpop.f32.mrb[11].mxu1 }
 0x33b   : > { %v1064_v17 = vpop.f32.mrb[12].mxu0 }
 0x33c   : > { %v1152_v7 = vadd.f32 %v1064_v17, %v885_v60  ;;  %v1066_v18 = vpop.f32.mrb[13].mxu0 }
 0x33d   : > { %v1153_v14 = vadd.f32 %v1066_v18, %v887_v8  ;;  %v1068_v19 = vpop.f32.mrb[14].mxu0 }
 0x33e   : > { %v1069_v22 = vpop.f32.mrb[15].mxu0 }
 0x33f   : > { %v1105_v24 = vpop.f32.mrb[12].mxu1 }
 0x340   : > { %v1154_v25 = vadd.f32 %v1105_v24, %v926_v52  ;;  %v1107_v10 = vpop.f32.mrb[13].mxu1 }
 0x341   : > { %v1155_v23 = vadd.f32 %v1107_v10, %v928_v63  ;;  %v1109_v26 = vpop.f32.mrb[14].mxu1 }
 0x342   : > { %v1110_v28 = vpop.f32.mrb[15].mxu1 }
 0x343   : > { %v1146_v30 = vpop.f32.mrb[16].mxu0 }
 0x344   : > { %v1156_v31 = vadd.f32 %v1146_v30, %v967_v29  ;;  %v3001_v33 = vpop.f32.mrb[17].mxu0 }
 0x345   : > { %v1149_v34 = vpop.f32.mrb[18].mxu0 }
 0x346   : > { %v3002_v27 = vpop.f32.mrb[19].mxu0 }
 0x347   : > { %v1249_v32 = vpop.f32.mrb[16].mxu1 }
 0x348   : > { %v1337_v35 = vadd.f32 %v1249_v32, %v1152_v7  ;;  %v1251_v38 = vpop.f32.mrb[17].mxu1 }
 0x349   : > { %v1338_v39 = vadd.f32 %v1251_v38, %v1153_v14  ;;  %v1253_v45 = vpop.f32.mrb[18].mxu1 }
 0x34a   : > { %v1254_v46 = vpop.f32.mrb[19].mxu1 }
 0x34b   : > { %v1290_v37 = vpop.f32.mrb[20].mxu0 }
 0x34c   : > { %v1339_v36 = vadd.f32 %v1290_v37, %v1154_v25  ;;  %v1292_v47 = vpop.f32.mrb[21].mxu0  ;;  %v2187_v37 = vpop.permute.xlu1 %2186 }
 0x34d   : > { %v1340_v51 = vadd.f32 %v1292_v47, %v1155_v23  ;;  %v1294_v54 = vpop.f32.mrb[22].mxu0 }
 0x34e   : > { %v1295_v55 = vpop.f32.mrb[23].mxu0 }
 0x34f   : > { %v1331_v56 = vpop.f32.mrb[20].mxu1 }
 0x350   : > { %v1341_v58 = vadd.f32 %v1331_v56, %v1156_v31  ;;  %v3009_v48 = vpop.f32.mrb[21].mxu1 }
 0x351   : > { %v1334_v44 = vpop.f32.mrb[22].mxu1 }
 0x352   : > { %v3010_v59 = vpop.f32.mrb[23].mxu1  ;;  %v2207_v44 = vpop.permute.xlu1 %2206 }
 0x353   : > { %v1434_v61 = vpop.f32.mrb[24].mxu0 }
 0x354   : > { %v4500_v0 = vadd.f32 %v1434_v61, %v1337_v35  ;;  %v1436_v53 = vpop.f32.mrb[25].mxu0 }
 0x355   : > { %v4502_v21 = vadd.f32 %v1436_v53, %v1338_v39  ;;  %v1438_v41 = vpop.f32.mrb[26].mxu0 }
 0x356   : > { %v1439_v1 = vpop.f32.mrb[27].mxu0  ;;  %v2013_v41 = vpop.permute.xlu0 %2012 }
 0x357   : > { %v2232_v1 = vsub.s32 0, %v3874_v3 }
 0x35b   : > { %v1475_v2 = vpop.f32.mrb[24].mxu1  ;;  %v1516_v4 = vpop.f32.mrb[28].mxu0 }
 0x35c   : > { %v4504_v5 = vadd.f32 %v1475_v2, %v1339_v36  ;;  %v4506_v43 = vadd.f32 %v1516_v4, %v1341_v58  ;;  %v1477_v20 = vpop.f32.mrb[25].mxu1  ;;  %v3017_v40 = vpop.f32.mrb[29].mxu0  ;;  %v2236_v2 = vsub.s32 1, %v3874_v3 }
 0x35d   : > { %v4508_v60 = vadd.f32 %v1477_v20, %v1340_v51  ;;  %v1479_v6 = vpop.f32.mrb[26].mxu1  ;;  %v1519_v8 = vpop.f32.mrb[30].mxu0  ;;  %v4512_v40 = vld [vmem:[#allocation14] sm:$0x1f] }
 0x35e   : > { %v1480_v11 = vpop.f32.mrb[27].mxu1  ;;  %v3018_v49 = vpop.f32.mrb[31].mxu0 }
 0x35f   : > { %v2240_v11 = vsub.s32 2, %v3874_v3 }
 0x363   : > { %v1603_v50 = vpop.f32.mrb[28].mxu1 }
 0x364   : > { %v1605_v52 = vpop.f32.mrb[29].mxu1 }
 0x365   : > { %v1607_v57 = vpop.f32.mrb[30].mxu1 }
 0x366   : > { %v1608_v63 = vpop.f32.mrb[31].mxu1  ;;  %v2233_v57 = vrot.slane %v4512_v40, %v2232_v1 }
 0x367   : > { %v1644_v12 = vpop.f32.mrb[32].mxu0 }
 0x368   : > { %v1646_v62 = vpop.f32.mrb[33].mxu0 }
 0x369   : > { %v1648_v13 = vpop.f32.mrb[34].mxu0 }
 0x36a   : > { %v1649_v29 = vpop.f32.mrb[35].mxu0 }
 0x36b   : > { %v1685_v42 = vpop.f32.mrb[32].mxu1 }
 0x36c   : > { %v3023_v9 = vpop.f32.mrb[33].mxu1 }
 0x36d   : > { %v1688_v15 = vpop.f32.mrb[34].mxu1 }
 0x36e   : > { %v3024_v17 = vpop.f32.mrb[35].mxu1 }
 0x36f   : > { %v1760_v7 = vpop.f32.mrb[36].mxu0  ;;  %v2244_v17 = vsub.s32 3, %v3874_v3 }
 0x370   : > { %v1761_v18 = vadd.f32 %v1760_v7, %v1603_v50  ;;  %v1762_v14 = vpop.f32.mrb[37].mxu0  ;;  %v2209_v50 = vadd.f32 %v2207_v44, %v4500_v0  ;;  %v2241_v0 = vrot.slane %v4512_v40, %v2240_v11 }
 0x371   : > { %v1763_v19 = vadd.f32 %v1762_v14, %v1605_v52  ;;  %v1764_v22 = vpop.f32.mrb[38].mxu0 }
 0x372   : > { %v1765_v24 = vpop.f32.mrb[39].mxu0  ;;  %v2211_v22 = vadd.f32 %v2207_v44, %v4504_v5 }
 0x373   : > { %v1801_v25 = vpop.f32.mrb[36].mxu1 }
 0x374   : > { %v1802_v10 = vadd.f32 %v1801_v25, %v1644_v12  ;;  %v1803_v23 = vpop.f32.mrb[37].mxu1  ;;  %v2210_v12 = vadd.f32 %v2207_v44, %v4502_v21  ;;  %v2214_v25 = vmax.f32 %v2209_v50, 0.0 }
 0x375   : > { %v1804_v26 = vadd.f32 %v1803_v23, %v1646_v62  ;;  %v1805_v28 = vpop.f32.mrb[38].mxu1  ;;  %v2237_v62 = vrot.slane %v4512_v40, %v2236_v2  ;;  %v2212_v23 = vadd.f32 %v2207_v44, %v4508_v60 }
 0x376   : > { %v1806_v30 = vpop.f32.mrb[39].mxu1  ;;  %v2215_v28 = vmax.f32 %v2210_v12, 0.0 }
 0x377   : > { %v1842_v31 = vpop.f32.mrb[40].mxu0 }
 0x378   : > { %v1843_v33 = vadd.f32 %v1842_v31, %v1685_v42  ;;  %v3029_v34 = vpop.f32.mrb[41].mxu0 }
 0x379   : > { %v1845_v27 = vpop.f32.mrb[42].mxu0 }
 0x37a   : > { %v3030_v32 = vpop.f32.mrb[43].mxu0 }
 0x37b   : > { %v1917_v35 = vpop.f32.mrb[40].mxu1 }
 0x37c   : > { %v2005_v38 = vadd.f32 %v1917_v35, %v1761_v18  ;;  %v1919_v39 = vpop.f32.mrb[41].mxu1 }
 0x37d   : > { %v2006_v45 = vadd.f32 %v1919_v39, %v1763_v19  ;;  %v1921_v46 = vpop.f32.mrb[42].mxu1 }
 0x37e   : > { %v1922_v36 = vpop.f32.mrb[43].mxu1  ;;  %v2189_v4 = vadd.f32 %v2187_v37, %v2005_v38  ;;  %v2213_v38 = vadd.f32 %v2207_v44, %v4506_v43 }
 0x37f   : > { %v1958_v47 = vpop.f32.mrb[44].mxu0  ;;  %v2190_v6 = vadd.f32 %v2187_v37, %v2006_v45  ;;  %v2216_v36 = vmax.f32 %v2211_v22, 0.0 }
 0x380   : > { %v2007_v51 = vadd.f32 %v1958_v47, %v1802_v10  ;;  %v1960_v54 = vpop.f32.mrb[45].mxu0  ;;  %v2194_v29 = vmax.f32 %v2189_v4, 0.0  ;;  %v2218_v2 = vmax.f32 %v2213_v38, 0.0 }
 0x381   : > { %v2008_v55 = vadd.f32 %v1960_v54, %v1804_v26  ;;  %v1962_v56 = vpop.f32.mrb[46].mxu0  ;;  %v2195_v7 = vmax.f32 %v2190_v6, 0.0 }
 0x382   : > { %v1963_v58 = vpop.f32.mrb[47].mxu0  ;;  %v2191_v42 = vadd.f32 %v2187_v37, %v2007_v51 }
 0x383   : > { %v1999_v48 = vpop.f32.mrb[44].mxu1  ;;  %v2192_v18 = vadd.f32 %v2187_v37, %v2008_v55  ;;  %v2217_v55 = vmax.f32 %v2212_v23, 0.0 }
 0x384   : > { %v2009_v59 = vadd.f32 %v1999_v48, %v1843_v33  ;;  %v3035_v61 = vpop.f32.mrb[45].mxu1  ;;  %v2196_v33 = vmax.f32 %v2191_v42, 0.0  ;;  %v2248_v48 = vsub.s32 4, %v3874_v3 }
 0x385   : > { %v2002_v53 = vpop.f32.mrb[46].mxu1  ;;  %v2197_v39 = vmax.f32 %v2192_v18, 0.0 }
 0x386   : > { %v3036_v20 = vpop.f32.mrb[47].mxu1  ;;  %v2193_v34 = vadd.f32 %v2187_v37, %v2009_v59 }
 0x387   : > { %v2091_v8 = vpop.f32.mrb[48].mxu0 }
 0x388   : > { %v2092_v49 = vadd.f32 %v2091_v8, %v2013_v41  ;;  %v2093_v52 = vpop.f32.mrb[49].mxu0  ;;  %v2198_v59 = vmax.f32 %v2193_v34, 0.0 }
 0x389   : > { %v2094_v63 = vadd.f32 %v2093_v52, %v2013_v41  ;;  %v2095_v13 = vpop.f32.mrb[50].mxu0 }
 0x38a   : > { %v2179_v9 = vmax.f32 %v2092_v49, 0.0  ;;  %v2096_v15 = vpop.f32.mrb[51].mxu0  ;;  %v2249_v49 = vrot.slane %v4512_v40, %v2248_v48  ;;  %v436_v48 = vld [vmem:[#allocation13] sm:$0xf] }
 0x38b   : > { %v2180_v14 = vmax.f32 %v2094_v63, 0.0  ;;  %v2132_v19 = vpop.f32.mrb[48].mxu1 }
 0x38c   : > { %v2199_v24 = vadd.f32 %v2194_v29, %v2179_v9  ;;  %v2133_v21 = vadd.f32 %v2132_v19, %v2013_v41  ;;  %v2134_v10 = vpop.f32.mrb[49].mxu1 }
 0x38d   : > { %v2200_v26 = vadd.f32 %v2195_v7, %v2180_v14  ;;  %v2135_v30 = vadd.f32 %v2134_v10, %v2013_v41  ;;  %v2136_v31 = vpop.f32.mrb[50].mxu1 }
 0x38e   : > { %v2219_v27 = vadd.f32 %v2214_v25, %v2199_v24  ;;  %v2181_v32 = vmax.f32 %v2133_v21, 0.0  ;;  %v2137_v35 = vpop.f32.mrb[51].mxu1 }
 0x38f   : > { %v2220_v45 = vadd.f32 %v2215_v28, %v2200_v26  ;;  %v2182_v5 = vmax.f32 %v2135_v30, 0.0  ;;  %v2173_v46 = vpop.f32.mrb[52].mxu0 }
 0x390   : > { %v2224_v47 = vmul.f32 0.33333334, %v2219_v27  ;;  %v2201_v51 = vadd.f32 %v2196_v33, %v2181_v32  ;;  %v2174_v54 = vadd.f32 %v2173_v46, %v2013_v41  ;;  %v3041_v60 = vpop.f32.mrb[53].mxu0  ;;  %v2245_v41 = vrot.slane %v4512_v40, %v2244_v17 }
 0x391   : > { %v2225_v56 = vmul.f32 0.33333334, %v2220_v45  ;;  %v2202_v58 = vadd.f32 %v2197_v39, %v2182_v5  ;;  %v2176_v37 = vpop.f32.mrb[54].mxu0 }
 0x392   : > { %v2255_v61 = vmul.f32 %v2233_v57, %v2224_v47  ;;  %v2221_v53 = vadd.f32 %v2216_v36, %v2201_v51  ;;  %v2183_v1 = vmax.f32 %v2174_v54, 0.0  ;;  %v3042_v43 = vpop.f32.mrb[55].mxu0 }
 0x393   : > { %v2222_v44 = vadd.f32 %v2217_v55, %v2202_v58  ;;  %v2256_v8 = vmul.f32 %v2237_v62, %v2225_v56 }
 0x394   : > { %v2260_v4 = vpack.c.bf16 %v2255_v61, %v2255_v61  ;;  %v2226_v20 = vmul.f32 0.33333334, %v2221_v53  ;;  %v2203_v6 = vadd.f32 %v2198_v59, %v2183_v1 }
 0x395   : > { %v2227_v11 = vmul.f32 0.33333334, %v2222_v44  ;;  %v2261_v13 = vpack.c.bf16 %v2256_v8, %v2256_v8 }
 0x396   : > { %v2257_v50 = vmul.f32 %v2241_v0, %v2226_v20  ;;  %v2223_v52 = vadd.f32 %v2218_v2, %v2203_v6  ;;  %v2289_v3 = vrot.slane %v2260_v4, 6  ;;  %v2270_v63 = vrot.slane %v2260_v4, 7 }
 0x397   : > { %v2258_v29 = vmul.f32 %v2245_v41, %v2227_v11  ;;  %v2271_v17 = vrot.slane %v2261_v13, 7  ;;  %v2290_v7 = vrot.slane %v2261_v13, 6 }
 0x398   : > { %v2262_v12 = vpack.c.bf16 %v2257_v50, %v2257_v50  ;;  %v2228_v57 = vmul.f32 0.33333334, %v2223_v52  ;;  %2294 = vrot.lane.b32.xlu1 %v2289_v3, %s3514_s26  ;;  %2275 = vrot.lane.b32.xlu0 %v2270_v63, %s3513_s12 }
 0x399   : > { %v2263_v40 = vpack.c.bf16 %v2258_v29, %v2258_v29 }
 0x39a   : > { %v2259_v42 = vmul.f32 %v2249_v49, %v2228_v57  ;;  %v2291_v9 = vrot.slane %v2262_v12, 6  ;;  %v2272_v62 = vrot.slane %v2262_v12, 7 }
 0x39b   : > { %v2273_v18 = vrot.slane %v2263_v40, 7  ;;  %v2292_v0 = vrot.slane %v2263_v40, 6 }
 0x39c   : > { %2298 = vrot.lane.b32.xlu1 %v2291_v9, %s3514_s26  ;;  %2279 = vrot.lane.b32.xlu0 %v2272_v62, %s3513_s12  ;;  %v2264_v15 = vpack.c.bf16 %v2259_v42, %v2259_v42 }
 0x39e   : > { %v2274_v14 = vrot.slane %v2264_v15, 7  ;;  %v2293_v19 = vrot.slane %v2264_v15, 6 }
 0x3a0   : > { %2277 = vrot.lane.b32.xlu1 %v2271_v17, %s3513_s12  ;;  %2296 = vrot.lane.b32.xlu0 %v2290_v7, %s3514_s26 }
 0x3a4   : > { %2281 = vrot.lane.b32.xlu1 %v2273_v18, %s3513_s12  ;;  %2283 = vrot.lane.b32.xlu0 %v2274_v14, %s3513_s12  ;;  %s417_s12 = scalar_lea.vmem [#allocation16], %s2892_s22 }
 0x3a8   : > { %2302 = vrot.lane.b32.xlu1 %v2293_v19, %s3514_s26  ;;  %2300 = vrot.lane.b32.xlu0 %v2292_v0, %s3514_s26  ;;  %v432_v19 = vld [vmem:[#allocation11 + $0x4] sm:$0x3]  ;;  %s2736_s26 = sshll.u32 %s417_s12, 4  ;;  %s4599_s26 = int_to_ptr.vmem [resolvable:$true] %s2736_s26 }
 0x3a9   : > { %s3416_s9 = scalar_lea.vmem %s4599_s26, 256 }
 0x3aa   : > { %p3417_p10 = scmp.ne.s32.totalorder %s4599_s26, %s3416_s9 }
 0x3ac   : > { %p3418_p11 = pnand %p3417_p10, %p4678_p1 }
 0x3ae   : > { %p3419_p12 = pneg %p3418_p11 }
 0x40a   : > { %v2295_v22 = vpop.permute.xlu1 %2294  ;;  %v2276_v24 = vpop.permute.xlu0 %2275 }
 0x40e   : > { %v2299_v25 = vpop.permute.xlu1 %2298  ;;  %v2280_v21 = vpop.permute.xlu0 %2279 }
 0x412   : > { %v2278_v10 = vpop.permute.xlu1 %2277  ;;  %v2297_v23 = vpop.permute.xlu0 %2296 }
 0x413   : > { %v2285_v26 = vsel %vm495_vm1, %v2276_v24, %v2278_v10  ;;  %v2286_v28 = vsel %vm495_vm1, %v2278_v10, %v2280_v21  ;;  %v2304_v30 = vsel %vm516_vm2, %v2295_v22, %v2297_v23  ;;  %v2305_v31 = vsel %vm516_vm2, %v2297_v23, %v2299_v25 }
 0x414   : > { %v2311_v33 = vsel %vm2308_vm0, %v2260_v4, %v2285_v26  ;;  %v2314_v34 = vsel %vm2308_vm0, %v2261_v13, %v2286_v28  ;;  %v431_v4 = vld [vmem:[#allocation11 + $0x2] sm:$0x3] }
 0x415   : > { %v2327_v27 = vsel %vm560_vm4, %v2314_v34, %v2305_v31  ;;  %v2325_v32 = vsel %vm560_vm4, %v2311_v33, %v2304_v30 }
 0x416   : > { %v2282_v35 = vpop.permute.xlu1 %2281  ;;  %2341 = vrot.lane.b32.xlu1 %v2327_v27, %s3525_s1  ;;  %2339 = vrot.lane.b32.xlu0 %v2325_v32, %s3525_s1  ;;  %v2284_v38 = vpop.permute.xlu0 %2283 }
 0x417   : > { %v2287_v39 = vsel %vm495_vm1, %v2280_v21, %v2282_v35  ;;  %v2288_v45 = vsel %vm495_vm1, %v2282_v35, %v2284_v38  ;;  %v2323_v56 = vsel %vm2308_vm0, %v2264_v15, %v2284_v38  ;;  %vm2349_vm1 = vcmask 531456   ;;  %v3188_v38 = vld [vmem:[%s3852_s25] sm:$0xff] }
 0x418   : > { %v2317_v36 = vsel %vm2308_vm0, %v2262_v12, %v2287_v39  ;;  %v2320_v47 = vsel %vm2308_vm0, %v2263_v40, %v2288_v45  ;;  %v430_v12 = vld [vmem:[#allocation11] sm:$0x3]  ;;  %v2694_v39 = vrot.slane %v3188_v38, 2 }
 0x419   : > { %v3189_v45 = vld [vmem:[%s3852_s25 + $0x8] sm:$0xf]  ;;  %s2955_s25 = sshll.u32 %s3595_s11, 8  ;;  %s3528_s11 = smov [#allocation16]  }
 0x41a   : > { %v2303_v5 = vpop.permute.xlu1 %2302  ;;  %2453 = vrot.lane.b32.xlu1 %v2325_v32, %s3526_s20  ;;  %v2301_v46 = vpop.permute.xlu0 %2300  ;;  %s4597_s18 = scalar_lea.hbm %s4649_s8, %s2955_s25  ;;  %s3420_s24 = sshll.u32 %s3528_s11, 4  ;;  %s3421_s24 = int_to_ptr.vmem [resolvable:$false] %s3420_s24 }
 0x41b   : > { %v2306_v51 = vsel %vm516_vm2, %v2299_v25, %v2301_v46  ;;  %v2307_v54 = vsel %vm516_vm2, %v2301_v46, %v2303_v5  ;;  %v2333_v58 = vsel %vm560_vm4, %v2323_v56, %v2303_v5  ;;  %vm2358_vm2 = vcmask 1042432   ;;  %s3422_s16 = scalar_lea.vmem %s3421_s24, 512  ;;  %p3423_p13 = scmp.lt.s32.totalorder %s4599_s26, %s3421_s24 }
 0x41c   : > { %v2329_v60 = vsel %vm560_vm4, %v2317_v36, %v2306_v51  ;;  %v2331_v55 = vsel %vm560_vm4, %v2320_v47, %v2307_v54  ;;  %vm2354_vm4 = vcmask 48128   ;;  %v2695_v5 = vrot.slane %v3189_v45, 2  ;;  %p3424_p3 = scmp.lt.s32.totalorder %s3422_s16, %s3416_s9 }
 0x41d   : > { %2343 = vrot.lane.b32.xlu0 %v2329_v60, %s3525_s1 }
 0x41e   : > { %2345 = vrot.lane.b32.xlu1 %v2331_v55, %s3525_s1  ;;  %v2697_v51 = vsel %vm592_vm6, %v2694_v39, %v2695_v5  ;;  %p3425_p6 = por %p3424_p3, %p3423_p13 }
 0x420   : > { %p3426_p9 = pnand %p3425_p6, %p3419_p12 }
 0x421   : > { %2455 = vrot.lane.b32.xlu0 %v2327_v27, %s3526_s20 }
 0x422   : > { %2457 = vrot.lane.b32.xlu1 %v2329_v60, %s3526_s20 }
 0x425   : > { %2347 = vrot.lane.b32.xlu0 %v2333_v58, %s3525_s1 }
 0x426   : > { %2461 = vrot.lane.b32.xlu1 %v2333_v58, %s3526_s20 }
 0x429   : > { %2565 = vrot.lane.b32.xlu0 %v2325_v32, %s3527_s14 }
 0x42a   : > { %2567 = vrot.lane.b32.xlu1 %v2327_v27, %s3527_s14 }
 0x42d   : > { %2459 = vrot.lane.b32.xlu0 %v2331_v55, %s3526_s20 }
 0x42e   : > { %2571 = vrot.lane.b32.xlu1 %v2331_v55, %s3527_s14 }
 0x431   : > { %2569 = vrot.lane.b32.xlu0 %v2329_v60, %s3527_s14 }
 0x432   : > { %2683 = vperm.xlu1 %3184, %v436_v48  }
 0x435   : > { %2573 = vrot.lane.b32.xlu0 %v2333_v58, %s3527_s14  ;;  %v2699_v58 = vunpack.c.l.bf16 %v2697_v51 }
 0x488   : > { %v2342_v37 = vpop.permute.xlu1 %2341  ;;  %v2340_v59 = vpop.permute.xlu0 %2339 }
 0x489   : > { %v2350_v53 = vsel %vm2349_vm1, %v2340_v59, %v2342_v37 }
 0x48a   : > { %v2360_v2 = vsel %vm2358_vm2, %v2350_v53, 0 }
 0x48c   : > { %v2454_v61 = vpop.permute.xlu1 %2453 }
 0x48f   : > { %v2344_v1 = vpop.permute.xlu0 %2343 }
 0x490   : > { %v2351_v43 = vsel %vm2349_vm1, %v2342_v37, %v2344_v1  ;;  %v2346_v44 = vpop.permute.xlu1 %2345 }
 0x491   : > { %2938 = vmatprep.subr.msk.bf16.mxu1 %vm2358_vm2, %v2351_v43  ;;  %v2352_v49 = vsel %vm2349_vm1, %v2344_v1, %v2346_v44 }
 0x492   : > { %2372 = vmatpush1.bf16.msra.mxu1 %v2360_v2  ;;  %v2366_v3 = vsel %vm2358_vm2, %v2352_v49, 0  ;;  %v2703_v2 = vcombine.high %v2699_v58, %v2699_v58 }
 0x493   : > { %v2456_v20 = vpop.permute.xlu0 %2455 }
 0x494   : > { %v2464_v6 = vsel %vm2463_vm3, %v2454_v61, %v2456_v20  ;;  %v2458_v8 = vpop.permute.xlu1 %2457 }
 0x495   : > { %v2472_v11 = vsel %vm2358_vm2, %v2464_v6, 0  ;;  %v2465_v41 = vsel %vm2463_vm3, %v2456_v20, %v2458_v8  ;;  %2939 = vmatmul.mubr.msk.bf16.vlgmr.msra.gmra.mrb[52].mxu1 %vm2354_vm4, %v431_v4  ;;  %v2700_v20 = vunpack.c.h.bf16 %v2697_v51 }
 0x496   : > { %2942 = vmatprep.subr.msk.bf16.mxu1 %vm2358_vm2, %v2465_v41  ;;  %2515 = vmatprep.mubr.bf16.mxu1 %v3520_v16 }
 0x497   : > { %2484 = vmatpush1.bf16.msra.mxu1 %v2472_v11  ;;  %v2348_v50 = vpop.permute.xlu0 %2347 }
 0x498   : > { %v2353_v52 = vsel %vm2349_vm1, %v2346_v44, %v2348_v50  ;;  %v2462_v63 = vpop.permute.xlu1 %2461 }
 0x499   : > { %2940 = vmatprep.subr.msk.bf16.mxu0 %vm2358_vm2, %v2353_v52 }
 0x49a   : > { %2413 = vmatpush1.bf16.msra.mxu0 %v2366_v3 }
 0x49b   : > { %v2566_v57 = vpop.permute.xlu0 %2565 }
 0x49c   : > { %v2568_v13 = vpop.permute.xlu1 %2567 }
 0x49d   : > { %2941 = vmatmul.mubr.msk.bf16.vlgmr.msra.gmra.mrb[56].mxu0 %vm2354_vm4, %v431_v4  ;;  %2943 = vmatmul.mubr.msk.bf16.vlgmr.msra.gmra.mrb[56].mxu1 %vm2354_vm4, %v430_v12  ;;  %v2576_v40 = vsel %vm2575_vm5, %v2566_v57, %v2568_v13 }
 0x49e   : > { %2556 = vmatprep.mubr.bf16.mxu0 %v3520_v16  ;;  %2627 = vmatprep.mubr.bf16.mxu1 %v3520_v16  ;;  %v2584_v7 = vsel %vm2358_vm2, %v2576_v40, 0 }
 0x49f   : > { %v2460_v29 = vpop.permute.xlu0 %2459 }
 0x4a0   : > { %v2466_v42 = vsel %vm2463_vm3, %v2458_v8, %v2460_v29  ;;  %v2467_v9 = vsel %vm2463_vm3, %v2460_v29, %v2462_v63  ;;  %v2572_v18 = vpop.permute.xlu1 %2571 }
 0x4a1   : > { %v2478_v62 = vsel %vm2358_vm2, %v2466_v42, 0  ;;  %2944 = vmatprep.subr.msk.bf16.mxu0 %vm2358_vm2, %v2467_v9 }
 0x4a2   : > { %2525 = vmatpush1.bf16.msra.mxu0 %v2478_v62 }
 0x4a3   : > { %v2570_v15 = vpop.permute.xlu0 %2569 }
 0x4a4   : > { %v2577_v17 = vsel %vm2575_vm5, %v2568_v13, %v2570_v15  ;;  %v2578_v14 = vsel %vm2575_vm5, %v2570_v15, %v2572_v18  ;;  %v2704_v13 = vcombine.high %v2700_v20, %v2700_v20 }
 0x4a5   : > { %2945 = vmatmul.mubr.msk.bf16.vlgmr.msra.gmra.mrb[60].mxu0 %vm2354_vm4, %v430_v12  ;;  %2946 = vmatprep.subr.msk.bf16.mxu1 %vm2358_vm2, %v2577_v17  ;;  %v2590_v24 = vsel %vm2358_vm2, %v2578_v14, 0 }
 0x4a6   : > { %2596 = vmatpush1.bf16.msra.mxu1 %v2584_v7  ;;  %2668 = vmatprep.mubr.bf16.mxu0 %v3520_v16 }
 0x4a7   : > { %v2574_v0 = vpop.permute.xlu0 %2573 }
 0x4a8   : > { %v2579_v22 = vsel %vm2575_vm5, %v2572_v18, %v2574_v0 }
 0x4a9   : > { %2947 = vmatmul.mubr.msk.bf16.vlgmr.msra.gmra.mrb[60].mxu1 %vm2354_vm4, %v432_v19  ;;  %2948 = vmatprep.subr.msk.bf16.mxu0 %vm2358_vm2, %v2579_v22 }
 0x4aa   : > { %2637 = vmatpush1.bf16.msra.mxu0 %v2590_v24 }
 0x4ad   : > { %2949 = vmatmul.mubr.msk.bf16.vlgmr.msra.gmra.mrb[64].mxu0 %vm2354_vm4, %v432_v19 }
 0x4b1   : > { %v2684_v59 = vpop.permute.xlu1 %2683 }
 0x568   : > { %v2405_v25 = vpop.f32.mrb[52].mxu1 }
 0x569   : > { %v2407_v21 = vpop.f32.mrb[53].mxu1 }
 0x56a   : > { %v2409_v10 = vpop.f32.mrb[54].mxu1 }
 0x56b   : > { %v2410_v23 = vpop.f32.mrb[55].mxu1 }
 0x570   : > { %v2446_v26 = vpop.f32.mrb[56].mxu0  ;;  %v2517_v16 = vpop.f32.mrb[56].mxu1 }
 0x571   : > { %v2448_v28 = vpop.f32.mrb[57].mxu0  ;;  %v2518_v30 = vadd.f32 %v2517_v16, %v2405_v25  ;;  %v2519_v31 = vpop.f32.mrb[57].mxu1 }
 0x572   : > { %v2450_v33 = vpop.f32.mrb[58].mxu0  ;;  %v2520_v34 = vadd.f32 %v2519_v31, %v2407_v21  ;;  %v2521_v27 = vpop.f32.mrb[58].mxu1 }
 0x573   : > { %v2451_v32 = vpop.f32.mrb[59].mxu0  ;;  %v2522_v35 = vpop.f32.mrb[59].mxu1 }
 0x578   : > { %v2558_v46 = vpop.f32.mrb[60].mxu0 }
 0x579   : > { %v2559_v36 = vadd.f32 %v2558_v46, %v2446_v26  ;;  %v2560_v47 = vpop.f32.mrb[61].mxu0 }
 0x57a   : > { %v2561_v54 = vadd.f32 %v2560_v47, %v2448_v28  ;;  %v2562_v60 = vpop.f32.mrb[62].mxu0 }
 0x57b   : > { %v2563_v55 = vpop.f32.mrb[63].mxu0 }
 0x57c   : > { %v2629_v56 = vpop.f32.mrb[60].mxu1 }
 0x57d   : > { %v2677_v48 = vadd.f32 %v2629_v56, %v2518_v30  ;;  %v2631_v37 = vpop.f32.mrb[61].mxu1 }
 0x57e   : > { %v2678_v61 = vadd.f32 %v2631_v37, %v2520_v34  ;;  %v2633_v53 = vpop.f32.mrb[62].mxu1 }
 0x57f   : > { %v2686_v1 = vadd.f32 %v2684_v59, %v2677_v48  ;;  %v2634_v43 = vpop.f32.mrb[63].mxu1 }
 0x580   : > { %v2687_v44 = vadd.f32 %v2684_v59, %v2678_v61  ;;  %v2670_v4 = vpop.f32.mrb[64].mxu0 }
 0x581   : > { %v2690_v6 = vmax.f32 %v2686_v1, 0.0  ;;  %v2679_v8 = vadd.f32 %v2670_v4, %v2559_v36  ;;  %v2672_v11 = vpop.f32.mrb[65].mxu0 }
 0x582   : > { %v2691_v41 = vmax.f32 %v2687_v44, 0.0  ;;  %v2680_v49 = vadd.f32 %v2672_v11, %v2561_v54  ;;  %v2674_v50 = vpop.f32.mrb[66].mxu0 }
 0x583   : > { %v2707_v52 = vadd.f32 %v2699_v58, %v2690_v6  ;;  %v2688_v3 = vadd.f32 %v2684_v59, %v2679_v8  ;;  %v2675_v63 = vpop.f32.mrb[67].mxu0 }
 0x584   : > { %v2708_v12 = vadd.f32 %v2703_v2, %v2691_v41  ;;  %v2689_v57 = vadd.f32 %v2684_v59, %v2680_v49 }
 0x585   : > { %v2692_v29 = vmax.f32 %v2688_v3, 0.0 }
 0x586   : > { %v2715_v42 = vcombine.low %v2707_v52, %v2708_v12  ;;  %v2693_v9 = vmax.f32 %v2689_v57, 0.0 }
 0x587   : > { %v2709_v62 = vadd.f32 %v2700_v20, %v2692_v29 }
 0x588   : > { %v2710_v40 = vadd.f32 %v2704_v13, %v2693_v9  ;;  %2719 = vst [vmem:[%s417_s12] sm:$0xff] %v2715_v42 }
 0x58a   : > { %v2716_v15 = vcombine.low %v2709_v62, %v2710_v40 }
 0x58c   : > { %2720 = vst [vmem:[%s417_s12 + $0x8] sm:$0xff] %v2716_v15 }
 0x58d   : > { %3429 = shalt.err (!%p3426_p9)
}
 0x58e   : > { %s3430_s23 = scalar_lea.hbm %s4597_s18, 256  ;;  %s3434_s14 = scalar_lea.hbm %s4649_s8, 512 }
 0x58f   : > { %p3431_p4 = scmp.ne.s32.totalorder %s4597_s18, %s3430_s23  ;;  %p3435_p5 = scmp.lt.u32.totalorder %s4597_s18, %s4649_s8 }
 0x590   : > { %p3436_p2 = scmp.lt.u32.totalorder %s3434_s14, %s3430_s23  ;;  %p3438_p10 = scmp.lt.u32.totalorder %s3430_s23, %s4597_s18 }
 0x591   : > { %p3432_p8 = pnand %p3431_p4, %p4678_p1 }
 0x592   : > { %p3437_p7 = por %p3436_p2, %p3435_p5 }
 0x593   : > { %p3433_p0 = pneg %p3432_p8 }
 0x594   : > { %p3439_p11 = por %p3438_p10, %p3437_p7 }
 0x596   : > { %p3440_p12 = pnand %p3439_p11, %p3433_p0 }
 0x598   : > { %3443 = shalt.err (!%p3440_p12)
}
 0x599   : > { %3076 = dma.vmem_to_hbm [thread:$0]  (%p4678_p1), %s4599_s26, 256, %s4597_s18, %s2722_s17  }
 0x59a PF: > { %s2748_s12 = sand.u32 1, %s3486_s27   ;;  %p4679_p13 = scmp.ne.s32.totalorder %s4667_s13, 0 }
 0x59b   : > { %p4680_p3 = scmp.ge.s32.totalorder %s3498_s30, 2  ;;  %s2749_s3 = scalar_lea.sflag [#allocation4], %s2748_s12 }
 0x59d   : > { %p3105_p6 = pnand %p4680_p3, %p4679_p13 }
 0x59f   : > { %3481 = dma.done.wait (!%p3105_p6), %s2749_s3, 256  }
 0x5a0   : > { %3483 = vsyncadd (!%p3105_p6), %s2749_s3, 4294967040  ;;  %p25_p9 = scmp.ge.s32.totalorder %s3778_s15, 4   ;;  %s4681_s27 = smov %s3490_s28 }
 0x5a1   : > { %s4682_s28 = smov %s3494_s29  ;;  %s4683_s29 = smov %s3790_s19 }
 0x5a2   : > { %s4684_s30 = smov %s3778_s15  ;;  %27 = sbr.rel (!%p25_p9) target bundleno = 12 (0xc), region = 125 }
 0x5a9   :  { %2754 = vsyncpa [#allocation3], 1 }
 0x5aa   :  { %2756 = vsyncpa [#allocation3 + $0x1], 1 }
 0x5ab   :  { %2757 = vsyncpa [#allocation6], 1 }
 0x5ac   :  { %2758 = vsyncpa [#allocation9], 1 }
 0x5ad   :  { %2759 = vsyncpa [#allocation12], 1 }
 0x5ae   :  { %2760 = vsyncpa [#allocation15], 1 }
 0x5af   :  { %2761 = vsyncpa [#allocation4], 1 }
 0x5b0   :  { %2763 = vsyncpa [#allocation4 + $0x1], 1 }

</bundles_post_ra>
